<compile_context>
chip_gen: v7x
topology: tpu7x:2x2x1
jax: 0.10.0
libtpu: 0.0.40
codegen_flags: <defaults>
</compile_context>

<pallas_src>
import functools

import numpy as np
import jax
import jax.numpy as jnp
from jax.experimental import pallas as pl
from jax.experimental.pallas import tpu as pltpu

LEAKY = 0.2
STDV = 0.1
SPECTRAL_RADIUS = 1.0


def _round_up(x, m):
    return (x + m - 1) // m * m


def _default_batch_blocks():
    # TODO(synk): pltpu.get_tpu_info() core-count field names are not stable
    # across jax versions; detect 2-TensorCore chips from the device kind.
    try:
        kind = jax.devices()[0].device_kind.lower()
    except Exception:
        return 1
    return 2 if "v7" in kind else 1


def esn_kernel(len_ref, inv_len_ref, x_ref, win_t_ref, w_t_ref,
               hs_ref, pool_ref, h_prev, *, leaky, tt):
    """One grid step == TT consecutive timesteps for one batch block.

    len_ref     : (Bb, 1)       int32  valid sequence length per example
    inv_len_ref : (Bb, 1)       f32    1/len (0 where len == 0)
    x_ref       : (TT, Bb, Dp)  mm     input chunk (time-major, matmul dtype)
    win_t_ref   : (Dp, Rp)      mm     Win^T (input weight, resident)
    w_t_ref     : (Rp, Rp)      mm     W^T  (recurrent weight, resident)
    hs_ref      : (TT, Bb, Rp)  hs_dt  hidden_states for this chunk (output slice)
    pool_ref    : (Bb, Rp)      f32    resident accumulator -> mean-pooled output
    h_prev      : (Bb, Rp)      f32    VMEM scratch carrying h across grid steps
    """
    c = pl.program_id(1)
    mm_dtype = w_t_ref.dtype

    @pl.when(c == 0)
    def _init():
        h_prev[...] = jnp.zeros_like(h_prev)
        pool_ref[...] = jnp.zeros_like(pool_ref)

    h = h_prev[...]
    lens = len_ref[...]                                            # (Bb, 1) int32

    for i in range(tt):                                            # static unroll
        # Fused input projection + recurrent matmul; accumulate in f32.
        pre = jnp.dot(x_ref[i], win_t_ref[...],
                      preferred_element_type=jnp.float32)
        pre = pre + jnp.dot(h.astype(mm_dtype), w_t_ref[...],
                            preferred_element_type=jnp.float32)
        h_new = jnp.tanh(pre)                                      # activation
        if leaky > 0.0:
            if i >= 2:
                a = leaky                                          # steady state
            else:
                # Scalar leak coefficient (0 for global step <= 1); avoids a
                # full vector select in the VPU stream.
                a = jnp.where(c * tt + i > 1,
                              jnp.float32(leaky), jnp.float32(0.0))
            h_new = (1.0 - a) * h_new + a * h
        hs_ref[i] = h_new.astype(hs_ref.dtype)                     # contiguous slab
        mask = (c * tt + i < lens).astype(jnp.float32)             # (Bb, 1)
        # Accumulate straight into the resident VMEM output block (no long
        # register-carried accumulator across the unroll).
        pool_ref[...] = pool_ref[...] + h_new * mask
        h = h_new

    h_prev[...] = h

    @pl.when(c == pl.num_programs(1) - 1)
    def _finalize():
        pool_ref[...] = pool_ref[...] * inv_len_ref[...]


def esn_forward(x_btd, lengths, win, w, *, leaky=LEAKY, tt=8,
                matmul_dtype=jnp.bfloat16, hs_dtype=jnp.bfloat16,
                batch_blocks=None):
    """x_btd: (B, T, D) f32; lengths: (B,) int; win: (R, D); w: (R, R).

    Returns (hidden_states (T, B, R) in hs_dtype, pooled (B, R) f32)."""
    B, T, D = x_btd.shape
    R = w.shape[0]

    matmul_dtype = jnp.dtype(matmul_dtype)
    hs_dtype = jnp.dtype(hs_dtype)

    b_align = 16 if (hs_dtype.itemsize < 4 or matmul_dtype.itemsize < 4) else 8
    Rp = _round_up(R, 128)         # lane-dense reservoir
    Dp = _round_up(D, 8)           # small contraction dim; x traffic is tiny

    if batch_blocks is None:
        batch_blocks = _default_batch_blocks()
    if batch_blocks > 1 and B <= b_align:
        batch_blocks = 1           # not enough real rows to split across cores
    Bp = _round_up(B, b_align * batch_blocks)
    Bb = Bp // batch_blocks

    # Timesteps per grid step: prefer a tt dividing T (avoid padded serial work).
    tt = max(1, min(tt, T))
    for d in range(tt, 0, -1):
        if T % d == 0 and d >= max(1, tt // 2):
            tt = d
            break

    mm_bytes = matmul_dtype.itemsize
    hs_bytes = hs_dtype.itemsize

    def _budget(ts):
        b = Rp * Rp * mm_bytes                # W^T   (single-buffered)
        b += Dp * Rp * mm_bytes               # Win^T (single-buffered)
        b += 2 * ts * Bb * Dp * mm_bytes      # x chunk (double-buffered)
        b += 2 * ts * Bb * Rp * hs_bytes      # hs chunk (double-buffered)
        b += 2 * Bb * Rp * 4                  # pool (resident output)
        b += 2 * 2 * Bb * 4                   # len / inv_len
        b += Bb * Rp * 4                      # h carry scratch
        return b

    VMEM_TARGET = 40 << 20                    # conservative: fits v7x 64 MiB VMEM
    while tt > 1 and _budget(tt) > VMEM_TARGET:
        tt = max(1, tt // 2)
    vmem_limit = min(max(int(_budget(tt) * 1.5), 16 << 20), 64 << 20)

    Tp = _round_up(T, tt)
    n_chunks = Tp // tt

    # Padded, time-major operands (all casts done once in the wrapper).
    x = jnp.asarray(x_btd, jnp.float32)
    x_tbd = jnp.zeros((Tp, Bp, Dp), matmul_dtype).at[:T, :B, :D].set(
        jnp.transpose(x, (1, 0, 2)).astype(matmul_dtype))
    win_t = jnp.zeros((Dp, Rp), matmul_dtype).at[:D, :R].set(
        jnp.asarray(win, jnp.float32).T.astype(matmul_dtype))
    w_t = jnp.zeros((Rp, Rp), matmul_dtype).at[:R, :R].set(
        jnp.asarray(w, jnp.float32).T.astype(matmul_dtype))
    len_p = jnp.zeros((Bp,), jnp.int32).at[:B].set(jnp.asarray(lengths, jnp.int32))
    len_col = len_p.reshape(Bp, 1)
    inv_len = jnp.where(
        len_p > 0, 1.0 / jnp.maximum(len_p, 1).astype(jnp.float32), 0.0
    ).reshape(Bp, 1)

    kernel = functools.partial(esn_kernel, leaky=float(leaky), tt=tt)

    def _call(single_buffer_weights):
        if single_buffer_weights:
            win_spec = pl.BlockSpec((Dp, Rp), lambda b, c: (0, 0),
                                    pipeline_mode=pl.Buffered(1))
            w_spec = pl.BlockSpec((Rp, Rp), lambda b, c: (0, 0),
                                  pipeline_mode=pl.Buffered(1))
        else:
            win_spec = pl.BlockSpec((Dp, Rp), lambda b, c: (0, 0))
            w_spec = pl.BlockSpec((Rp, Rp), lambda b, c: (0, 0))
        return pl.pallas_call(
            kernel,
            out_shape=(
                jax.ShapeDtypeStruct((Tp, Bp, Rp), hs_dtype),       # hidden states
                jax.ShapeDtypeStruct((Bp, Rp), jnp.float32),        # pooled
            ),
            grid_spec=pltpu.PrefetchScalarGridSpec(
                num_scalar_prefetch=0,
                grid=(batch_blocks, n_chunks),
                in_specs=[
                    pl.BlockSpec((Bb, 1), lambda b, c: (b, 0)),      # lengths
                    pl.BlockSpec((Bb, 1), lambda b, c: (b, 0)),      # 1/len
                    pl.BlockSpec((tt, Bb, Dp), lambda b, c: (c, b, 0)),  # x chunk
                    win_spec,                                        # Win^T (const)
                    w_spec,                                          # W^T   (const)
                ],
                out_specs=[
                    pl.BlockSpec((tt, Bb, Rp), lambda b, c: (c, b, 0)),  # hs chunk
                    pl.BlockSpec((Bb, Rp), lambda b, c: (b, 0)),     # pooled (resident)
                ],
                scratch_shapes=[pltpu.VMEM((Bb, Rp), jnp.float32)],  # h carry
            ),
            compiler_params=pltpu.CompilerParams(
                dimension_semantics=("parallel", "arbitrary"),       # batch || chunks serial
                vmem_limit_bytes=vmem_limit),
        )(len_col, inv_len, x_tbd, win_t, w_t)

    try:
        hs_pad, pool_pad = jax.block_until_ready(_call(True))
    except Exception:
        # Fallback if this jax/libtpu rejects single-buffered (Buffered(1)) specs.
        hs_pad, pool_pad = jax.block_until_ready(_call(False))

    return hs_pad[:T, :B, :R], pool_pad[:B, :R]


def init_esn_params(key, n_inputs, n_reservoir, stdv=STDV,
                    spectral_radius=SPECTRAL_RADIUS):
    """Deterministic synthetic parameter init mirroring ESN.__init__."""
    k1, k2 = jax.random.split(key)
    W = jax.random.uniform(k1, (n_reservoir, n_reservoir),
                           minval=-0.5, maxval=0.5, dtype=jnp.float32)
    Win = jax.random.uniform(k2, (n_reservoir, n_inputs),
                             minval=-stdv, maxval=stdv, dtype=jnp.float32)
    if spectral_radius > 0:
        radius = np.max(np.abs(np.linalg.eigvals(np.asarray(W, dtype=np.float64))))
        W = W * np.float32(spectral_radius / radius)
    return W, Win


def esn_reference(x_btd, lengths, win, w, leaky):
    """Pure-JAX reference reproducing ESN.esn + masked mean pool (f32).

    (Precision.HIGHEST here is test-reference only — not on the perf path.)"""
    B, T, D = x_btd.shape
    R = w.shape[0]
    hp = jax.lax.Precision.HIGHEST
    h_prev = jnp.zeros((B, R), jnp.float32)
    hs = []
    for i in range(T):
        h = jnp.tanh(jnp.dot(x_btd[:, i, :], win.T, precision=hp)
                     + jnp.dot(h_prev, w.T, precision=hp))
        if i > 1 and leaky > 0:
            h = (1.0 - leaky) * h + leaky * h_prev
        hs.append(h)
        h_prev = h
    hs = jnp.stack(hs, axis=0)                                      # (T, B, R)
    mask = (jnp.arange(T)[:, None] < lengths[None, :]).astype(jnp.float32)
    pooled = (hs * mask[:, :, None]).sum(0) / \
        jnp.maximum(lengths, 1)[:, None].astype(jnp.float32)
    return hs, pooled


if __name__ == "__main__":
    B, T, D, R = 2, 8, 32, 64   # batch, seq, input_dim, output_dim (reservoir)

    key = jax.random.PRNGKey(0)
    kx, kp = jax.random.split(key)
    x = jax.random.normal(kx, (B, T, D), dtype=jnp.float32)          # (B, T, D)
    lengths = jnp.array([T, 5], dtype=jnp.int32)

    W, Win = init_esn_params(kp, n_inputs=D, n_reservoir=R)
    hs_ref, pooled_ref = esn_reference(x, lengths, Win, W, LEAKY)

    # 1) f32 everywhere: exact-semantics check against the reference.
    hs32, pooled32 = esn_forward(x, lengths, Win, W,
                                 matmul_dtype=jnp.float32, hs_dtype=jnp.float32)
    jax.block_until_ready((hs32, pooled32))
    assert hs32.shape == (T, B, R) and pooled32.shape == (B, R)
    assert np.allclose(np.asarray(hs32), np.asarray(hs_ref), atol=5e-3, rtol=5e-3)
    assert np.allclose(np.asarray(pooled32), np.asarray(pooled_ref),
                       atol=5e-3, rtol=5e-3)

    # 2) default fast path: bf16 matmuls + bf16 hidden-state stream (f32 carry).
    hs, pooled = esn_forward(x, lengths, Win, W)
    jax.block_until_ready((hs, pooled))
    assert hs.shape == (T, B, R) and pooled.shape == (B, R)
    hs_f = np.asarray(jnp.asarray(hs, jnp.float32))
    assert np.allclose(hs_f, np.asarray(hs_ref), atol=1e-1, rtol=1e-1)
    assert np.allclose(np.asarray(pooled), np.asarray(pooled_ref),
                       atol=1e-1, rtol=1e-1)

    print("KERNEL_OK")
</pallas_src>

<mosaic_0001>
module attributes {stable_mosaic.version = 11 : i64} {
  func.func @esn_kernel(%arg0: i32, %arg1: i32, %arg2: memref<8x1xi32, #tpu.memory_space<vmem>>, %arg3: memref<8x1xf32, #tpu.memory_space<vmem>>, %arg4: memref<8x8x32xf32, #tpu.memory_space<vmem>>, %arg5: memref<32x128xf32, #tpu.memory_space<vmem>>, %arg6: memref<128x128xf32, #tpu.memory_space<vmem>>, %arg7: memref<8x8x128xf32, #tpu.memory_space<vmem>>, %arg8: memref<8x128xf32, #tpu.memory_space<vmem>>, %arg9: memref<8x128xf32, #tpu.memory_space<vmem>>) attributes {dimension_semantics = [#tpu.dimension_semantics<parallel>, #tpu.dimension_semantics<arbitrary>], iteration_bounds = array<i64: 1, 1>, scalar_prefetch = 0 : i64, scratch_operands = 1 : i64, tpu.core_type = #tpu.core_type<tc>, window_params = [{transform_indices = @transform_0, window_bounds = array<i64: 8, 1>}, {transform_indices = @transform_1, window_bounds = array<i64: 8, 1>}, {transform_indices = @transform_2, window_bounds = array<i64: 8, 8, 32>}, {pipeline_mode = #tpu.pipeline_mode<synchronous>, transform_indices = @transform_3, window_bounds = array<i64: 32, 128>}, {pipeline_mode = #tpu.pipeline_mode<synchronous>, transform_indices = @transform_4, window_bounds = array<i64: 128, 128>}, {transform_indices = @transform_5, window_bounds = array<i64: 8, 8, 128>}, {transform_indices = @transform_6, window_bounds = array<i64: 8, 128>}]} {
    %c0_i32 = arith.constant 0 : i32
    %0 = arith.cmpi eq, %arg1, %c0_i32 : i32
    %1 = arith.extui %0 : i1 to i32
    %c0_i32_0 = arith.constant 0 : i32
    %2 = arith.cmpi ne, %1, %c0_i32_0 : i32
    scf.if %2 {
      %cst_160 = arith.constant 0.000000e+00 : f32
      %235 = vector.broadcast %cst_160 : f32 to vector<8x128xf32>
      %c0_161 = arith.constant 0 : index
      %c0_162 = arith.constant 0 : index
      %236 = vector.load %arg9[%c0_161, %c0_162] : memref<8x128xf32, #tpu.memory_space<vmem>>, vector<8x128xf32>
      tpu.vector_store %arg9[%c0_161, %c0_162], %235 {strides = array<i32>} : memref<8x128xf32, #tpu.memory_space<vmem>>, vector<8x128xf32>,
      %cst_163 = arith.constant 0.000000e+00 : f32
      %237 = vector.broadcast %cst_163 : f32 to vector<8x128xf32>
      %c0_164 = arith.constant 0 : index
      %c0_165 = arith.constant 0 : index
      %238 = vector.load %arg8[%c0_164, %c0_165] : memref<8x128xf32, #tpu.memory_space<vmem>>, vector<8x128xf32>
      tpu.vector_store %arg8[%c0_164, %c0_165], %237 {strides = array<i32>} : memref<8x128xf32, #tpu.memory_space<vmem>>, vector<8x128xf32>,
    } else {
    }
    %c0 = arith.constant 0 : index
    %c0_1 = arith.constant 0 : index
    %3 = vector.load %arg9[%c0, %c0_1] : memref<8x128xf32, #tpu.memory_space<vmem>>, vector<8x128xf32>
    %c0_2 = arith.constant 0 : index
    %c0_3 = arith.constant 0 : index
    %4 = vector.load %arg2[%c0_2, %c0_3] : memref<8x1xi32, #tpu.memory_space<vmem>>, vector<8x1xi32>
    %c0_4 = arith.constant 0 : index
    %c0_5 = arith.constant 0 : index
    %c0_6 = arith.constant 0 : index
    %5 = vector.load %arg4[%c0_4, %c0_5, %c0_6] : memref<8x8x32xf32, #tpu.memory_space<vmem>>, vector<1x8x32xf32>
    %6 = vector.shape_cast %5 : vector<1x8x32xf32> to vector<8x32xf32>
    %c0_7 = arith.constant 0 : index
    %c0_8 = arith.constant 0 : index
    %7 = vector.load %arg5[%c0_7, %c0_8] : memref<32x128xf32, #tpu.memory_space<vmem>>, vector<32x128xf32>
    %cst = arith.constant dense<0.000000e+00> : vector<8x128xf32>
    %8 = tpu.matmul %6, %7, %cst {dimension_numbers = #tpu.dot_dimension_numbers<[1], [0], [0], [1], [0, 0, 1, 1], [], []>} : vector<8x32xf32>, vector<32x128xf32>, vector<8x128xf32> -> vector<8x128xf32>
    %c0_9 = arith.constant 0 : index
    %c0_10 = arith.constant 0 : index
    %9 = vector.load %arg6[%c0_9, %c0_10] : memref<128x128xf32, #tpu.memory_space<vmem>>, vector<128x128xf32>
    %cst_11 = arith.constant dense<0.000000e+00> : vector<8x128xf32>
    %10 = tpu.matmul %3, %9, %cst_11 {dimension_numbers = #tpu.dot_dimension_numbers<[1], [0], [0], [1], [0, 0, 1, 1], [], []>} : vector<8x128xf32>, vector<128x128xf32>, vector<8x128xf32> -> vector<8x128xf32>
    %11 = arith.addf %8, %10 : vector<8x128xf32>
    %12 = math.tanh %11 : vector<8x128xf32>
    %c8_i32 = arith.constant 8 : i32
    %13 = arith.muli %arg1, %c8_i32 : i32
    %c0_i32_12 = arith.constant 0 : i32
    %14 = arith.addi %13, %c0_i32_12 : i32
    %c1_i32 = arith.constant 1 : i32
    %15 = arith.cmpi sgt, %14, %c1_i32 : i32
    %cst_13 = arith.constant 2.000000e-01 : f32
    %cst_14 = arith.constant 0.000000e+00 : f32
    %16 = arith.select %15, %cst_13, %cst_14 : f32
    %cst_15 = arith.constant 1.000000e+00 : f32
    %17 = arith.subf %cst_15, %16 : f32
    %18 = vector.broadcast %17 : f32 to vector<8x128xf32>
    %19 = arith.mulf %18, %12 : vector<8x128xf32>
    %20 = vector.broadcast %16 : f32 to vector<8x128xf32>
    %21 = arith.mulf %20, %3 : vector<8x128xf32>
    %22 = arith.addf %19, %21 : vector<8x128xf32>
    %c0_16 = arith.constant 0 : index
    %c0_17 = arith.constant 0 : index
    %c0_18 = arith.constant 0 : index
    %23 = vector.load %arg7[%c0_16, %c0_17, %c0_18] : memref<8x8x128xf32, #tpu.memory_space<vmem>>, vector<1x8x128xf32>
    %24 = vector.shape_cast %23 : vector<1x8x128xf32> to vector<8x128xf32>
    %25 = vector.shape_cast %22 : vector<8x128xf32> to vector<1x8x128xf32>
    tpu.vector_store %arg7[%c0_16, %c0_17, %c0_18], %25 {strides = array<i32>} : memref<8x8x128xf32, #tpu.memory_space<vmem>>, vector<1x8x128xf32>,
    %c8_i32_19 = arith.constant 8 : i32
    %26 = arith.muli %arg1, %c8_i32_19 : i32
    %c0_i32_20 = arith.constant 0 : i32
    %27 = arith.addi %26, %c0_i32_20 : i32
    %28 = vector.broadcast %27 : i32 to vector<8x1xi32>
    %29 = arith.cmpi slt, %28, %4 : vector<8x1xi32>
    %30 = arith.extui %29 : vector<8x1xi1> to vector<8x1xi32>
    %31 = arith.sitofp %30 : vector<8x1xi32> to vector<8x1xf32>
    %c0_21 = arith.constant 0 : index
    %c0_22 = arith.constant 0 : index
    %32 = vector.load %arg8[%c0_21, %c0_22] : memref<8x128xf32, #tpu.memory_space<vmem>>, vector<8x128xf32>
    %33 = vector.broadcast %31 : vector<8x1xf32> to vector<8x128xf32>
    %34 = arith.mulf %22, %33 : vector<8x128xf32>
    %35 = arith.addf %32, %34 : vector<8x128xf32>
    %c0_23 = arith.constant 0 : index
    %c0_24 = arith.constant 0 : index
    %36 = vector.load %arg8[%c0_23, %c0_24] : memref<8x128xf32, #tpu.memory_space<vmem>>, vector<8x128xf32>
    tpu.vector_store %arg8[%c0_23, %c0_24], %35 {strides = array<i32>} : memref<8x128xf32, #tpu.memory_space<vmem>>, vector<8x128xf32>,
    %c1 = arith.constant 1 : index
    %c0_25 = arith.constant 0 : index
    %c0_26 = arith.constant 0 : index
    %37 = vector.load %arg4[%c1, %c0_25, %c0_26] : memref<8x8x32xf32, #tpu.memory_space<vmem>>, vector<1x8x32xf32>
    %38 = vector.shape_cast %37 : vector<1x8x32xf32> to vector<8x32xf32>
    %c0_27 = arith.constant 0 : index
    %c0_28 = arith.constant 0 : index
    %39 = vector.load %arg5[%c0_27, %c0_28] : memref<32x128xf32, #tpu.memory_space<vmem>>, vector<32x128xf32>
    %cst_29 = arith.constant dense<0.000000e+00> : vector<8x128xf32>
    %40 = tpu.matmul %38, %39, %cst_29 {dimension_numbers = #tpu.dot_dimension_numbers<[1], [0], [0], [1], [0, 0, 1, 1], [], []>} : vector<8x32xf32>, vector<32x128xf32>, vector<8x128xf32> -> vector<8x128xf32>
    %c0_30 = arith.constant 0 : index
    %c0_31 = arith.constant 0 : index
    %41 = vector.load %arg6[%c0_30, %c0_31] : memref<128x128xf32, #tpu.memory_space<vmem>>, vector<128x128xf32>
    %cst_32 = arith.constant dense<0.000000e+00> : vector<8x128xf32>
    %42 = tpu.matmul %22, %41, %cst_32 {dimension_numbers = #tpu.dot_dimension_numbers<[1], [0], [0], [1], [0, 0, 1, 1], [], []>} : vector<8x128xf32>, vector<128x128xf32>, vector<8x128xf32> -> vector<8x128xf32>
    %43 = arith.addf %40, %42 : vector<8x128xf32>
    %44 = math.tanh %43 : vector<8x128xf32>
    %c8_i32_33 = arith.constant 8 : i32
    %45 = arith.muli %arg1, %c8_i32_33 : i32
    %c1_i32_34 = arith.constant 1 : i32
    %46 = arith.addi %45, %c1_i32_34 : i32
    %c1_i32_35 = arith.constant 1 : i32
    %47 = arith.cmpi sgt, %46, %c1_i32_35 : i32
    %cst_36 = arith.constant 2.000000e-01 : f32
    %cst_37 = arith.constant 0.000000e+00 : f32
    %48 = arith.select %47, %cst_36, %cst_37 : f32
    %cst_38 = arith.constant 1.000000e+00 : f32
    %49 = arith.subf %cst_38, %48 : f32
    %50 = vector.broadcast %49 : f32 to vector<8x128xf32>
    %51 = arith.mulf %50, %44 : vector<8x128xf32>
    %52 = vector.broadcast %48 : f32 to vector<8x128xf32>
    %53 = arith.mulf %52, %22 : vector<8x128xf32>
    %54 = arith.addf %51, %53 : vector<8x128xf32>
    %c1_39 = arith.constant 1 : index
    %c0_40 = arith.constant 0 : index
    %c0_41 = arith.constant 0 : index
    %55 = vector.load %arg7[%c1_39, %c0_40, %c0_41] : memref<8x8x128xf32, #tpu.memory_space<vmem>>, vector<1x8x128xf32>
    %56 = vector.shape_cast %55 : vector<1x8x128xf32> to vector<8x128xf32>
    %57 = vector.shape_cast %54 : vector<8x128xf32> to vector<1x8x128xf32>
    tpu.vector_store %arg7[%c1_39, %c0_40, %c0_41], %57 {strides = array<i32>} : memref<8x8x128xf32, #tpu.memory_space<vmem>>, vector<1x8x128xf32>,
    %c8_i32_42 = arith.constant 8 : i32
    %58 = arith.muli %arg1, %c8_i32_42 : i32
    %c1_i32_43 = arith.constant 1 : i32
    %59 = arith.addi %58, %c1_i32_43 : i32
    %60 = vector.broadcast %59 : i32 to vector<8x1xi32>
    %61 = arith.cmpi slt, %60, %4 : vector<8x1xi32>
    %62 = arith.extui %61 : vector<8x1xi1> to vector<8x1xi32>
    %63 = arith.sitofp %62 : vector<8x1xi32> to vector<8x1xf32>
    %c0_44 = arith.constant 0 : index
    %c0_45 = arith.constant 0 : index
    %64 = vector.load %arg8[%c0_44, %c0_45] : memref<8x128xf32, #tpu.memory_space<vmem>>, vector<8x128xf32>
    %65 = vector.broadcast %63 : vector<8x1xf32> to vector<8x128xf32>
    %66 = arith.mulf %54, %65 : vector<8x128xf32>
    %67 = arith.addf %64, %66 : vector<8x128xf32>
    %c0_46 = arith.constant 0 : index
    %c0_47 = arith.constant 0 : index
    %68 = vector.load %arg8[%c0_46, %c0_47] : memref<8x128xf32, #tpu.memory_space<vmem>>, vector<8x128xf32>
    tpu.vector_store %arg8[%c0_46, %c0_47], %67 {strides = array<i32>} : memref<8x128xf32, #tpu.memory_space<vmem>>, vector<8x128xf32>,
    %c2 = arith.constant 2 : index
    %c0_48 = arith.constant 0 : index
    %c0_49 = arith.constant 0 : index
    %69 = vector.load %arg4[%c2, %c0_48, %c0_49] : memref<8x8x32xf32, #tpu.memory_space<vmem>>, vector<1x8x32xf32>
    %70 = vector.shape_cast %69 : vector<1x8x32xf32> to vector<8x32xf32>
    %c0_50 = arith.constant 0 : index
    %c0_51 = arith.constant 0 : index
    %71 = vector.load %arg5[%c0_50, %c0_51] : memref<32x128xf32, #tpu.memory_space<vmem>>, vector<32x128xf32>
    %cst_52 = arith.constant dense<0.000000e+00> : vector<8x128xf32>
    %72 = tpu.matmul %70, %71, %cst_52 {dimension_numbers = #tpu.dot_dimension_numbers<[1], [0], [0], [1], [0, 0, 1, 1], [], []>} : vector<8x32xf32>, vector<32x128xf32>, vector<8x128xf32> -> vector<8x128xf32>
    %c0_53 = arith.constant 0 : index
    %c0_54 = arith.constant 0 : index
    %73 = vector.load %arg6[%c0_53, %c0_54] : memref<128x128xf32, #tpu.memory_space<vmem>>, vector<128x128xf32>
    %cst_55 = arith.constant dense<0.000000e+00> : vector<8x128xf32>
    %74 = tpu.matmul %54, %73, %cst_55 {dimension_numbers = #tpu.dot_dimension_numbers<[1], [0], [0], [1], [0, 0, 1, 1], [], []>} : vector<8x128xf32>, vector<128x128xf32>, vector<8x128xf32> -> vector<8x128xf32>
    %75 = arith.addf %72, %74 : vector<8x128xf32>
    %76 = math.tanh %75 : vector<8x128xf32>
    %cst_56 = arith.constant 8.000000e-01 : f32
    %77 = vector.broadcast %cst_56 : f32 to vector<8x128xf32>
    %78 = arith.mulf %77, %76 : vector<8x128xf32>
    %cst_57 = arith.constant 2.000000e-01 : f32
    %79 = vector.broadcast %cst_57 : f32 to vector<8x128xf32>
    %80 = arith.mulf %79, %54 : vector<8x128xf32>
    %81 = arith.addf %78, %80 : vector<8x128xf32>
    %c2_58 = arith.constant 2 : index
    %c0_59 = arith.constant 0 : index
    %c0_60 = arith.constant 0 : index
    %82 = vector.load %arg7[%c2_58, %c0_59, %c0_60] : memref<8x8x128xf32, #tpu.memory_space<vmem>>, vector<1x8x128xf32>
    %83 = vector.shape_cast %82 : vector<1x8x128xf32> to vector<8x128xf32>
    %84 = vector.shape_cast %81 : vector<8x128xf32> to vector<1x8x128xf32>
    tpu.vector_store %arg7[%c2_58, %c0_59, %c0_60], %84 {strides = array<i32>} : memref<8x8x128xf32, #tpu.memory_space<vmem>>, vector<1x8x128xf32>,
    %c8_i32_61 = arith.constant 8 : i32
    %85 = arith.muli %arg1, %c8_i32_61 : i32
    %c2_i32 = arith.constant 2 : i32
    %86 = arith.addi %85, %c2_i32 : i32
    %87 = vector.broadcast %86 : i32 to vector<8x1xi32>
    %88 = arith.cmpi slt, %87, %4 : vector<8x1xi32>
    %89 = arith.extui %88 : vector<8x1xi1> to vector<8x1xi32>
    %90 = arith.sitofp %89 : vector<8x1xi32> to vector<8x1xf32>
    %c0_62 = arith.constant 0 : index
    %c0_63 = arith.constant 0 : index
    %91 = vector.load %arg8[%c0_62, %c0_63] : memref<8x128xf32, #tpu.memory_space<vmem>>, vector<8x128xf32>
    %92 = vector.broadcast %90 : vector<8x1xf32> to vector<8x128xf32>
    %93 = arith.mulf %81, %92 : vector<8x128xf32>
    %94 = arith.addf %91, %93 : vector<8x128xf32>
    %c0_64 = arith.constant 0 : index
    %c0_65 = arith.constant 0 : index
    %95 = vector.load %arg8[%c0_64, %c0_65] : memref<8x128xf32, #tpu.memory_space<vmem>>, vector<8x128xf32>
    tpu.vector_store %arg8[%c0_64, %c0_65], %94 {strides = array<i32>} : memref<8x128xf32, #tpu.memory_space<vmem>>, vector<8x128xf32>,
    %c3 = arith.constant 3 : index
    %c0_66 = arith.constant 0 : index
    %c0_67 = arith.constant 0 : index
    %96 = vector.load %arg4[%c3, %c0_66, %c0_67] : memref<8x8x32xf32, #tpu.memory_space<vmem>>, vector<1x8x32xf32>
    %97 = vector.shape_cast %96 : vector<1x8x32xf32> to vector<8x32xf32>
    %c0_68 = arith.constant 0 : index
    %c0_69 = arith.constant 0 : index
    %98 = vector.load %arg5[%c0_68, %c0_69] : memref<32x128xf32, #tpu.memory_space<vmem>>, vector<32x128xf32>
    %cst_70 = arith.constant dense<0.000000e+00> : vector<8x128xf32>
    %99 = tpu.matmul %97, %98, %cst_70 {dimension_numbers = #tpu.dot_dimension_numbers<[1], [0], [0], [1], [0, 0, 1, 1], [], []>} : vector<8x32xf32>, vector<32x128xf32>, vector<8x128xf32> -> vector<8x128xf32>
    %c0_71 = arith.constant 0 : index
    %c0_72 = arith.constant 0 : index
    %100 = vector.load %arg6[%c0_71, %c0_72] : memref<128x128xf32, #tpu.memory_space<vmem>>, vector<128x128xf32>
    %cst_73 = arith.constant dense<0.000000e+00> : vector<8x128xf32>
    %101 = tpu.matmul %81, %100, %cst_73 {dimension_numbers = #tpu.dot_dimension_numbers<[1], [0], [0], [1], [0, 0, 1, 1], [], []>} : vector<8x128xf32>, vector<128x128xf32>, vector<8x128xf32> -> vector<8x128xf32>
    %102 = arith.addf %99, %101 : vector<8x128xf32>
    %103 = math.tanh %102 : vector<8x128xf32>
    %cst_74 = arith.constant 8.000000e-01 : f32
    %104 = vector.broadcast %cst_74 : f32 to vector<8x128xf32>
    %105 = arith.mulf %104, %103 : vector<8x128xf32>
    %cst_75 = arith.constant 2.000000e-01 : f32
    %106 = vector.broadcast %cst_75 : f32 to vector<8x128xf32>
    %107 = arith.mulf %106, %81 : vector<8x128xf32>
    %108 = arith.addf %105, %107 : vector<8x128xf32>
    %c3_76 = arith.constant 3 : index
    %c0_77 = arith.constant 0 : index
    %c0_78 = arith.constant 0 : index
    %109 = vector.load %arg7[%c3_76, %c0_77, %c0_78] : memref<8x8x128xf32, #tpu.memory_space<vmem>>, vector<1x8x128xf32>
    %110 = vector.shape_cast %109 : vector<1x8x128xf32> to vector<8x128xf32>
    %111 = vector.shape_cast %108 : vector<8x128xf32> to vector<1x8x128xf32>
    tpu.vector_store %arg7[%c3_76, %c0_77, %c0_78], %111 {strides = array<i32>} : memref<8x8x128xf32, #tpu.memory_space<vmem>>, vector<1x8x128xf32>,
    %c8_i32_79 = arith.constant 8 : i32
    %112 = arith.muli %arg1, %c8_i32_79 : i32
    %c3_i32 = arith.constant 3 : i32
    %113 = arith.addi %112, %c3_i32 : i32
    %114 = vector.broadcast %113 : i32 to vector<8x1xi32>
    %115 = arith.cmpi slt, %114, %4 : vector<8x1xi32>
    %116 = arith.extui %115 : vector<8x1xi1> to vector<8x1xi32>
    %117 = arith.sitofp %116 : vector<8x1xi32> to vector<8x1xf32>
    %c0_80 = arith.constant 0 : index
    %c0_81 = arith.constant 0 : index
    %118 = vector.load %arg8[%c0_80, %c0_81] : memref<8x128xf32, #tpu.memory_space<vmem>>, vector<8x128xf32>
    %119 = vector.broadcast %117 : vector<8x1xf32> to vector<8x128xf32>
    %120 = arith.mulf %108, %119 : vector<8x128xf32>
    %121 = arith.addf %118, %120 : vector<8x128xf32>
    %c0_82 = arith.constant 0 : index
    %c0_83 = arith.constant 0 : index
    %122 = vector.load %arg8[%c0_82, %c0_83] : memref<8x128xf32, #tpu.memory_space<vmem>>, vector<8x128xf32>
    tpu.vector_store %arg8[%c0_82, %c0_83], %121 {strides = array<i32>} : memref<8x128xf32, #tpu.memory_space<vmem>>, vector<8x128xf32>,
    %c4 = arith.constant 4 : index
    %c0_84 = arith.constant 0 : index
    %c0_85 = arith.constant 0 : index
    %123 = vector.load %arg4[%c4, %c0_84, %c0_85] : memref<8x8x32xf32, #tpu.memory_space<vmem>>, vector<1x8x32xf32>
    %124 = vector.shape_cast %123 : vector<1x8x32xf32> to vector<8x32xf32>
    %c0_86 = arith.constant 0 : index
    %c0_87 = arith.constant 0 : index
    %125 = vector.load %arg5[%c0_86, %c0_87] : memref<32x128xf32, #tpu.memory_space<vmem>>, vector<32x128xf32>
    %cst_88 = arith.constant dense<0.000000e+00> : vector<8x128xf32>
    %126 = tpu.matmul %124, %125, %cst_88 {dimension_numbers = #tpu.dot_dimension_numbers<[1], [0], [0], [1], [0, 0, 1, 1], [], []>} : vector<8x32xf32>, vector<32x128xf32>, vector<8x128xf32> -> vector<8x128xf32>
    %c0_89 = arith.constant 0 : index
    %c0_90 = arith.constant 0 : index
    %127 = vector.load %arg6[%c0_89, %c0_90] : memref<128x128xf32, #tpu.memory_space<vmem>>, vector<128x128xf32>
    %cst_91 = arith.constant dense<0.000000e+00> : vector<8x128xf32>
    %128 = tpu.matmul %108, %127, %cst_91 {dimension_numbers = #tpu.dot_dimension_numbers<[1], [0], [0], [1], [0, 0, 1, 1], [], []>} : vector<8x128xf32>, vector<128x128xf32>, vector<8x128xf32> -> vector<8x128xf32>
    %129 = arith.addf %126, %128 : vector<8x128xf32>
    %130 = math.tanh %129 : vector<8x128xf32>
    %cst_92 = arith.constant 8.000000e-01 : f32
    %131 = vector.broadcast %cst_92 : f32 to vector<8x128xf32>
    %132 = arith.mulf %131, %130 : vector<8x128xf32>
    %cst_93 = arith.constant 2.000000e-01 : f32
    %133 = vector.broadcast %cst_93 : f32 to vector<8x128xf32>
    %134 = arith.mulf %133, %108 : vector<8x128xf32>
    %135 = arith.addf %132, %134 : vector<8x128xf32>
    %c4_94 = arith.constant 4 : index
    %c0_95 = arith.constant 0 : index
    %c0_96 = arith.constant 0 : index
    %136 = vector.load %arg7[%c4_94, %c0_95, %c0_96] : memref<8x8x128xf32, #tpu.memory_space<vmem>>, vector<1x8x128xf32>
    %137 = vector.shape_cast %136 : vector<1x8x128xf32> to vector<8x128xf32>
    %138 = vector.shape_cast %135 : vector<8x128xf32> to vector<1x8x128xf32>
    tpu.vector_store %arg7[%c4_94, %c0_95, %c0_96], %138 {strides = array<i32>} : memref<8x8x128xf32, #tpu.memory_space<vmem>>, vector<1x8x128xf32>,
    %c8_i32_97 = arith.constant 8 : i32
    %139 = arith.muli %arg1, %c8_i32_97 : i32
    %c4_i32 = arith.constant 4 : i32
    %140 = arith.addi %139, %c4_i32 : i32
    %141 = vector.broadcast %140 : i32 to vector<8x1xi32>
    %142 = arith.cmpi slt, %141, %4 : vector<8x1xi32>
    %143 = arith.extui %142 : vector<8x1xi1> to vector<8x1xi32>
    %144 = arith.sitofp %143 : vector<8x1xi32> to vector<8x1xf32>
    %c0_98 = arith.constant 0 : index
    %c0_99 = arith.constant 0 : index
    %145 = vector.load %arg8[%c0_98, %c0_99] : memref<8x128xf32, #tpu.memory_space<vmem>>, vector<8x128xf32>
    %146 = vector.broadcast %144 : vector<8x1xf32> to vector<8x128xf32>
    %147 = arith.mulf %135, %146 : vector<8x128xf32>
    %148 = arith.addf %145, %147 : vector<8x128xf32>
    %c0_100 = arith.constant 0 : index
    %c0_101 = arith.constant 0 : index
    %149 = vector.load %arg8[%c0_100, %c0_101] : memref<8x128xf32, #tpu.memory_space<vmem>>, vector<8x128xf32>
    tpu.vector_store %arg8[%c0_100, %c0_101], %148 {strides = array<i32>} : memref<8x128xf32, #tpu.memory_space<vmem>>, vector<8x128xf32>,
    %c5 = arith.constant 5 : index
    %c0_102 = arith.constant 0 : index
    %c0_103 = arith.constant 0 : index
    %150 = vector.load %arg4[%c5, %c0_102, %c0_103] : memref<8x8x32xf32, #tpu.memory_space<vmem>>, vector<1x8x32xf32>
    %151 = vector.shape_cast %150 : vector<1x8x32xf32> to vector<8x32xf32>
    %c0_104 = arith.constant 0 : index
    %c0_105 = arith.constant 0 : index
    %152 = vector.load %arg5[%c0_104, %c0_105] : memref<32x128xf32, #tpu.memory_space<vmem>>, vector<32x128xf32>
    %cst_106 = arith.constant dense<0.000000e+00> : vector<8x128xf32>
    %153 = tpu.matmul %151, %152, %cst_106 {dimension_numbers = #tpu.dot_dimension_numbers<[1], [0], [0], [1], [0, 0, 1, 1], [], []>} : vector<8x32xf32>, vector<32x128xf32>, vector<8x128xf32> -> vector<8x128xf32>
    %c0_107 = arith.constant 0 : index
    %c0_108 = arith.constant 0 : index
    %154 = vector.load %arg6[%c0_107, %c0_108] : memref<128x128xf32, #tpu.memory_space<vmem>>, vector<128x128xf32>
    %cst_109 = arith.constant dense<0.000000e+00> : vector<8x128xf32>
    %155 = tpu.matmul %135, %154, %cst_109 {dimension_numbers = #tpu.dot_dimension_numbers<[1], [0], [0], [1], [0, 0, 1, 1], [], []>} : vector<8x128xf32>, vector<128x128xf32>, vector<8x128xf32> -> vector<8x128xf32>
    %156 = arith.addf %153, %155 : vector<8x128xf32>
    %157 = math.tanh %156 : vector<8x128xf32>
    %cst_110 = arith.constant 8.000000e-01 : f32
    %158 = vector.broadcast %cst_110 : f32 to vector<8x128xf32>
    %159 = arith.mulf %158, %157 : vector<8x128xf32>
    %cst_111 = arith.constant 2.000000e-01 : f32
    %160 = vector.broadcast %cst_111 : f32 to vector<8x128xf32>
    %161 = arith.mulf %160, %135 : vector<8x128xf32>
    %162 = arith.addf %159, %161 : vector<8x128xf32>
    %c5_112 = arith.constant 5 : index
    %c0_113 = arith.constant 0 : index
    %c0_114 = arith.constant 0 : index
    %163 = vector.load %arg7[%c5_112, %c0_113, %c0_114] : memref<8x8x128xf32, #tpu.memory_space<vmem>>, vector<1x8x128xf32>
    %164 = vector.shape_cast %163 : vector<1x8x128xf32> to vector<8x128xf32>
    %165 = vector.shape_cast %162 : vector<8x128xf32> to vector<1x8x128xf32>
    tpu.vector_store %arg7[%c5_112, %c0_113, %c0_114], %165 {strides = array<i32>} : memref<8x8x128xf32, #tpu.memory_space<vmem>>, vector<1x8x128xf32>,
    %c8_i32_115 = arith.constant 8 : i32
    %166 = arith.muli %arg1, %c8_i32_115 : i32
    %c5_i32 = arith.constant 5 : i32
    %167 = arith.addi %166, %c5_i32 : i32
    %168 = vector.broadcast %167 : i32 to vector<8x1xi32>
    %169 = arith.cmpi slt, %168, %4 : vector<8x1xi32>
    %170 = arith.extui %169 : vector<8x1xi1> to vector<8x1xi32>
    %171 = arith.sitofp %170 : vector<8x1xi32> to vector<8x1xf32>
    %c0_116 = arith.constant 0 : index
    %c0_117 = arith.constant 0 : index
    %172 = vector.load %arg8[%c0_116, %c0_117] : memref<8x128xf32, #tpu.memory_space<vmem>>, vector<8x128xf32>
    %173 = vector.broadcast %171 : vector<8x1xf32> to vector<8x128xf32>
    %174 = arith.mulf %162, %173 : vector<8x128xf32>
    %175 = arith.addf %172, %174 : vector<8x128xf32>
    %c0_118 = arith.constant 0 : index
    %c0_119 = arith.constant 0 : index
    %176 = vector.load %arg8[%c0_118, %c0_119] : memref<8x128xf32, #tpu.memory_space<vmem>>, vector<8x128xf32>
    tpu.vector_store %arg8[%c0_118, %c0_119], %175 {strides = array<i32>} : memref<8x128xf32, #tpu.memory_space<vmem>>, vector<8x128xf32>,
    %c6 = arith.constant 6 : index
    %c0_120 = arith.constant 0 : index
    %c0_121 = arith.constant 0 : index
    %177 = vector.load %arg4[%c6, %c0_120, %c0_121] : memref<8x8x32xf32, #tpu.memory_space<vmem>>, vector<1x8x32xf32>
    %178 = vector.shape_cast %177 : vector<1x8x32xf32> to vector<8x32xf32>
    %c0_122 = arith.constant 0 : index
    %c0_123 = arith.constant 0 : index
    %179 = vector.load %arg5[%c0_122, %c0_123] : memref<32x128xf32, #tpu.memory_space<vmem>>, vector<32x128xf32>
    %cst_124 = arith.constant dense<0.000000e+00> : vector<8x128xf32>
    %180 = tpu.matmul %178, %179, %cst_124 {dimension_numbers = #tpu.dot_dimension_numbers<[1], [0], [0], [1], [0, 0, 1, 1], [], []>} : vector<8x32xf32>, vector<32x128xf32>, vector<8x128xf32> -> vector<8x128xf32>
    %c0_125 = arith.constant 0 : index
    %c0_126 = arith.constant 0 : index
    %181 = vector.load %arg6[%c0_125, %c0_126] : memref<128x128xf32, #tpu.memory_space<vmem>>, vector<128x128xf32>
    %cst_127 = arith.constant dense<0.000000e+00> : vector<8x128xf32>
    %182 = tpu.matmul %162, %181, %cst_127 {dimension_numbers = #tpu.dot_dimension_numbers<[1], [0], [0], [1], [0, 0, 1, 1], [], []>} : vector<8x128xf32>, vector<128x128xf32>, vector<8x128xf32> -> vector<8x128xf32>
    %183 = arith.addf %180, %182 : vector<8x128xf32>
    %184 = math.tanh %183 : vector<8x128xf32>
    %cst_128 = arith.constant 8.000000e-01 : f32
    %185 = vector.broadcast %cst_128 : f32 to vector<8x128xf32>
    %186 = arith.mulf %185, %184 : vector<8x128xf32>
    %cst_129 = arith.constant 2.000000e-01 : f32
    %187 = vector.broadcast %cst_129 : f32 to vector<8x128xf32>
    %188 = arith.mulf %187, %162 : vector<8x128xf32>
    %189 = arith.addf %186, %188 : vector<8x128xf32>
    %c6_130 = arith.constant 6 : index
    %c0_131 = arith.constant 0 : index
    %c0_132 = arith.constant 0 : index
    %190 = vector.load %arg7[%c6_130, %c0_131, %c0_132] : memref<8x8x128xf32, #tpu.memory_space<vmem>>, vector<1x8x128xf32>
    %191 = vector.shape_cast %190 : vector<1x8x128xf32> to vector<8x128xf32>
    %192 = vector.shape_cast %189 : vector<8x128xf32> to vector<1x8x128xf32>
    tpu.vector_store %arg7[%c6_130, %c0_131, %c0_132], %192 {strides = array<i32>} : memref<8x8x128xf32, #tpu.memory_space<vmem>>, vector<1x8x128xf32>,
    %c8_i32_133 = arith.constant 8 : i32
    %193 = arith.muli %arg1, %c8_i32_133 : i32
    %c6_i32 = arith.constant 6 : i32
    %194 = arith.addi %193, %c6_i32 : i32
    %195 = vector.broadcast %194 : i32 to vector<8x1xi32>
    %196 = arith.cmpi slt, %195, %4 : vector<8x1xi32>
    %197 = arith.extui %196 : vector<8x1xi1> to vector<8x1xi32>
    %198 = arith.sitofp %197 : vector<8x1xi32> to vector<8x1xf32>
    %c0_134 = arith.constant 0 : index
    %c0_135 = arith.constant 0 : index
    %199 = vector.load %arg8[%c0_134, %c0_135] : memref<8x128xf32, #tpu.memory_space<vmem>>, vector<8x128xf32>
    %200 = vector.broadcast %198 : vector<8x1xf32> to vector<8x128xf32>
    %201 = arith.mulf %189, %200 : vector<8x128xf32>
    %202 = arith.addf %199, %201 : vector<8x128xf32>
    %c0_136 = arith.constant 0 : index
    %c0_137 = arith.constant 0 : index
    %203 = vector.load %arg8[%c0_136, %c0_137] : memref<8x128xf32, #tpu.memory_space<vmem>>, vector<8x128xf32>
    tpu.vector_store %arg8[%c0_136, %c0_137], %202 {strides = array<i32>} : memref<8x128xf32, #tpu.memory_space<vmem>>, vector<8x128xf32>,
    %c7 = arith.constant 7 : index
    %c0_138 = arith.constant 0 : index
    %c0_139 = arith.constant 0 : index
    %204 = vector.load %arg4[%c7, %c0_138, %c0_139] : memref<8x8x32xf32, #tpu.memory_space<vmem>>, vector<1x8x32xf32>
    %205 = vector.shape_cast %204 : vector<1x8x32xf32> to vector<8x32xf32>
    %c0_140 = arith.constant 0 : index
    %c0_141 = arith.constant 0 : index
    %206 = vector.load %arg5[%c0_140, %c0_141] : memref<32x128xf32, #tpu.memory_space<vmem>>, vector<32x128xf32>
    %cst_142 = arith.constant dense<0.000000e+00> : vector<8x128xf32>
    %207 = tpu.matmul %205, %206, %cst_142 {dimension_numbers = #tpu.dot_dimension_numbers<[1], [0], [0], [1], [0, 0, 1, 1], [], []>} : vector<8x32xf32>, vector<32x128xf32>, vector<8x128xf32> -> vector<8x128xf32>
    %c0_143 = arith.constant 0 : index
    %c0_144 = arith.constant 0 : index
    %208 = vector.load %arg6[%c0_143, %c0_144] : memref<128x128xf32, #tpu.memory_space<vmem>>, vector<128x128xf32>
    %cst_145 = arith.constant dense<0.000000e+00> : vector<8x128xf32>
    %209 = tpu.matmul %189, %208, %cst_145 {dimension_numbers = #tpu.dot_dimension_numbers<[1], [0], [0], [1], [0, 0, 1, 1], [], []>} : vector<8x128xf32>, vector<128x128xf32>, vector<8x128xf32> -> vector<8x128xf32>
    %210 = arith.addf %207, %209 : vector<8x128xf32>
    %211 = math.tanh %210 : vector<8x128xf32>
    %cst_146 = arith.constant 8.000000e-01 : f32
    %212 = vector.broadcast %cst_146 : f32 to vector<8x128xf32>
    %213 = arith.mulf %212, %211 : vector<8x128xf32>
    %cst_147 = arith.constant 2.000000e-01 : f32
    %214 = vector.broadcast %cst_147 : f32 to vector<8x128xf32>
    %215 = arith.mulf %214, %189 : vector<8x128xf32>
    %216 = arith.addf %213, %215 : vector<8x128xf32>
    %c7_148 = arith.constant 7 : index
    %c0_149 = arith.constant 0 : index
    %c0_150 = arith.constant 0 : index
    %217 = vector.load %arg7[%c7_148, %c0_149, %c0_150] : memref<8x8x128xf32, #tpu.memory_space<vmem>>, vector<1x8x128xf32>
    %218 = vector.shape_cast %217 : vector<1x8x128xf32> to vector<8x128xf32>
    %219 = vector.shape_cast %216 : vector<8x128xf32> to vector<1x8x128xf32>
    tpu.vector_store %arg7[%c7_148, %c0_149, %c0_150], %219 {strides = array<i32>} : memref<8x8x128xf32, #tpu.memory_space<vmem>>, vector<1x8x128xf32>,
    %c8_i32_151 = arith.constant 8 : i32
    %220 = arith.muli %arg1, %c8_i32_151 : i32
    %c7_i32 = arith.constant 7 : i32
    %221 = arith.addi %220, %c7_i32 : i32
    %222 = vector.broadcast %221 : i32 to vector<8x1xi32>
    %223 = arith.cmpi slt, %222, %4 : vector<8x1xi32>
    %224 = arith.extui %223 : vector<8x1xi1> to vector<8x1xi32>
    %225 = arith.sitofp %224 : vector<8x1xi32> to vector<8x1xf32>
    %c0_152 = arith.constant 0 : index
    %c0_153 = arith.constant 0 : index
    %226 = vector.load %arg8[%c0_152, %c0_153] : memref<8x128xf32, #tpu.memory_space<vmem>>, vector<8x128xf32>
    %227 = vector.broadcast %225 : vector<8x1xf32> to vector<8x128xf32>
    %228 = arith.mulf %216, %227 : vector<8x128xf32>
    %229 = arith.addf %226, %228 : vector<8x128xf32>
    %c0_154 = arith.constant 0 : index
    %c0_155 = arith.constant 0 : index
    %230 = vector.load %arg8[%c0_154, %c0_155] : memref<8x128xf32, #tpu.memory_space<vmem>>, vector<8x128xf32>
    tpu.vector_store %arg8[%c0_154, %c0_155], %229 {strides = array<i32>} : memref<8x128xf32, #tpu.memory_space<vmem>>, vector<8x128xf32>,
    %c0_156 = arith.constant 0 : index
    %c0_157 = arith.constant 0 : index
    %231 = vector.load %arg9[%c0_156, %c0_157] : memref<8x128xf32, #tpu.memory_space<vmem>>, vector<8x128xf32>
    tpu.vector_store %arg9[%c0_156, %c0_157], %216 {strides = array<i32>} : memref<8x128xf32, #tpu.memory_space<vmem>>, vector<8x128xf32>,
    %c0_i32_158 = arith.constant 0 : i32
    %232 = arith.cmpi eq, %arg1, %c0_i32_158 : i32
    %233 = arith.extui %232 : i1 to i32
    %c0_i32_159 = arith.constant 0 : i32
    %234 = arith.cmpi ne, %233, %c0_i32_159 : i32
    scf.if %234 {
      %c0_160 = arith.constant 0 : index
      %c0_161 = arith.constant 0 : index
      %235 = vector.load %arg8[%c0_160, %c0_161] : memref<8x128xf32, #tpu.memory_space<vmem>>, vector<8x128xf32>
      %c0_162 = arith.constant 0 : index
      %c0_163 = arith.constant 0 : index
      %236 = vector.load %arg3[%c0_162, %c0_163] : memref<8x1xf32, #tpu.memory_space<vmem>>, vector<8x1xf32>
      %237 = vector.broadcast %236 : vector<8x1xf32> to vector<8x128xf32>
      %238 = arith.mulf %235, %237 : vector<8x128xf32>
      %c0_164 = arith.constant 0 : index
      %c0_165 = arith.constant 0 : index
      %239 = vector.load %arg8[%c0_164, %c0_165] : memref<8x128xf32, #tpu.memory_space<vmem>>, vector<8x128xf32>
      tpu.vector_store %arg8[%c0_164, %c0_165], %238 {strides = array<i32>} : memref<8x128xf32, #tpu.memory_space<vmem>>, vector<8x128xf32>,
    } else {
    }
    return
  }
  func.func @transform_0(%arg0: i32, %arg1: i32) -> (i32, i32) {
    %c0_i32 = arith.constant 0 : i32
    %c0_i32_0 = arith.constant 0 : i32
    return %arg0, %c0_i32 : i32, i32
  }
  func.func @transform_1(%arg0: i32, %arg1: i32) -> (i32, i32) {
    %c0_i32 = arith.constant 0 : i32
    %c0_i32_0 = arith.constant 0 : i32
    return %arg0, %c0_i32 : i32, i32
  }
  func.func @transform_2(%arg0: i32, %arg1: i32) -> (i32, i32, i32) {
    %c0_i32 = arith.constant 0 : i32
    %c0_i32_0 = arith.constant 0 : i32
    return %arg1, %arg0, %c0_i32 : i32, i32, i32
  }
  func.func @transform_3(%arg0: i32, %arg1: i32) -> (i32, i32) {
    %c0_i32 = arith.constant 0 : i32
    %c0_i32_0 = arith.constant 0 : i32
    %c0_i32_1 = arith.constant 0 : i32
    return %c0_i32, %c0_i32_0 : i32, i32
  }
  func.func @transform_4(%arg0: i32, %arg1: i32) -> (i32, i32) {
    %c0_i32 = arith.constant 0 : i32
    %c0_i32_0 = arith.constant 0 : i32
    %c0_i32_1 = arith.constant 0 : i32
    return %c0_i32, %c0_i32_0 : i32, i32
  }
  func.func @transform_5(%arg0: i32, %arg1: i32) -> (i32, i32, i32) {
    %c0_i32 = arith.constant 0 : i32
    %c0_i32_0 = arith.constant 0 : i32
    return %arg1, %arg0, %c0_i32 : i32, i32, i32
  }
  func.func @transform_6(%arg0: i32, %arg1: i32) -> (i32, i32) {
    %c0_i32 = arith.constant 0 : i32
    %c0_i32_0 = arith.constant 0 : i32
    return %arg0, %c0_i32 : i32, i32
  }
}

module attributes {stable_mosaic.version = 11 : i64} {
  func.func @esn_kernel(%arg0: i32, %arg1: i32, %arg2: memref<8x1xi32, #tpu.memory_space<vmem>>, %arg3: memref<8x1xf32, #tpu.memory_space<vmem>>, %arg4: memref<8x8x32xf32, #tpu.memory_space<vmem>>, %arg5: memref<32x128xf32, #tpu.memory_space<vmem>>, %arg6: memref<128x128xf32, #tpu.memory_space<vmem>>, %arg7: memref<8x8x128xf32, #tpu.memory_space<vmem>>, %arg8: memref<8x128xf32, #tpu.memory_space<vmem>>, %arg9: memref<8x128xf32, #tpu.memory_space<vmem>>) attributes {dimension_semantics = [#tpu.dimension_semantics<parallel>, #tpu.dimension_semantics<arbitrary>], iteration_bounds = array<i64: 1, 1>, scalar_prefetch = 0 : i64, scratch_operands = 1 : i64, tpu.core_type = #tpu.core_type<tc>, window_params = [{transform_indices = @transform_0, window_bounds = array<i64: 8, 1>}, {transform_indices = @transform_1, window_bounds = array<i64: 8, 1>}, {transform_indices = @transform_2, window_bounds = array<i64: 8, 8, 32>}, {pipeline_mode = #tpu.pipeline_mode<synchronous>, transform_indices = @transform_3, window_bounds = array<i64: 32, 128>}, {pipeline_mode = #tpu.pipeline_mode<synchronous>, transform_indices = @transform_4, window_bounds = array<i64: 128, 128>}, {transform_indices = @transform_5, window_bounds = array<i64: 8, 8, 128>}, {transform_indices = @transform_6, window_bounds = array<i64: 8, 128>}]} {
    %c0_i32 = arith.constant 0 : i32
    %0 = arith.cmpi eq, %arg1, %c0_i32 : i32
    %1 = arith.extui %0 : i1 to i32
    %c0_i32_0 = arith.constant 0 : i32
    %2 = arith.cmpi ne, %1, %c0_i32_0 : i32
    scf.if %2 {
      %cst_160 = arith.constant 0.000000e+00 : f32
      %235 = vector.broadcast %cst_160 : f32 to vector<8x128xf32>
      %c0_161 = arith.constant 0 : index
      %c0_162 = arith.constant 0 : index
      %236 = vector.load %arg9[%c0_161, %c0_162] : memref<8x128xf32, #tpu.memory_space<vmem>>, vector<8x128xf32>
      tpu.vector_store %arg9[%c0_161, %c0_162], %235 {strides = array<i32>} : memref<8x128xf32, #tpu.memory_space<vmem>>, vector<8x128xf32>,
      %cst_163 = arith.constant 0.000000e+00 : f32
      %237 = vector.broadcast %cst_163 : f32 to vector<8x128xf32>
      %c0_164 = arith.constant 0 : index
      %c0_165 = arith.constant 0 : index
      %238 = vector.load %arg8[%c0_164, %c0_165] : memref<8x128xf32, #tpu.memory_space<vmem>>, vector<8x128xf32>
      tpu.vector_store %arg8[%c0_164, %c0_165], %237 {strides = array<i32>} : memref<8x128xf32, #tpu.memory_space<vmem>>, vector<8x128xf32>,
    } else {
    }
    %c0 = arith.constant 0 : index
    %c0_1 = arith.constant 0 : index
    %3 = vector.load %arg9[%c0, %c0_1] : memref<8x128xf32, #tpu.memory_space<vmem>>, vector<8x128xf32>
    %c0_2 = arith.constant 0 : index
    %c0_3 = arith.constant 0 : index
    %4 = vector.load %arg2[%c0_2, %c0_3] : memref<8x1xi32, #tpu.memory_space<vmem>>, vector<8x1xi32>
    %c0_4 = arith.constant 0 : index
    %c0_5 = arith.constant 0 : index
    %c0_6 = arith.constant 0 : index
    %5 = vector.load %arg4[%c0_4, %c0_5, %c0_6] : memref<8x8x32xf32, #tpu.memory_space<vmem>>, vector<1x8x32xf32>
    %6 = vector.shape_cast %5 : vector<1x8x32xf32> to vector<8x32xf32>
    %c0_7 = arith.constant 0 : index
    %c0_8 = arith.constant 0 : index
    %7 = vector.load %arg5[%c0_7, %c0_8] : memref<32x128xf32, #tpu.memory_space<vmem>>, vector<32x128xf32>
    %cst = arith.constant dense<0.000000e+00> : vector<8x128xf32>
    %8 = tpu.matmul %6, %7, %cst {dimension_numbers = #tpu.dot_dimension_numbers<[1], [0], [0], [1], [0, 0, 1, 1], [], []>} : vector<8x32xf32>, vector<32x128xf32>, vector<8x128xf32> -> vector<8x128xf32>
    %c0_9 = arith.constant 0 : index
    %c0_10 = arith.constant 0 : index
    %9 = vector.load %arg6[%c0_9, %c0_10] : memref<128x128xf32, #tpu.memory_space<vmem>>, vector<128x128xf32>
    %cst_11 = arith.constant dense<0.000000e+00> : vector<8x128xf32>
    %10 = tpu.matmul %3, %9, %cst_11 {dimension_numbers = #tpu.dot_dimension_numbers<[1], [0], [0], [1], [0, 0, 1, 1], [], []>} : vector<8x128xf32>, vector<128x128xf32>, vector<8x128xf32> -> vector<8x128xf32>
    %11 = arith.addf %8, %10 : vector<8x128xf32>
    %12 = math.tanh %11 : vector<8x128xf32>
    %c8_i32 = arith.constant 8 : i32
    %13 = arith.muli %arg1, %c8_i32 : i32
    %c0_i32_12 = arith.constant 0 : i32
    %14 = arith.addi %13, %c0_i32_12 : i32
    %c1_i32 = arith.constant 1 : i32
    %15 = arith.cmpi sgt, %14, %c1_i32 : i32
    %cst_13 = arith.constant 2.000000e-01 : f32
    %cst_14 = arith.constant 0.000000e+00 : f32
    %16 = arith.select %15, %cst_13, %cst_14 : f32
    %cst_15 = arith.constant 1.000000e+00 : f32
    %17 = arith.subf %cst_15, %16 : f32
    %18 = vector.broadcast %17 : f32 to vector<8x128xf32>
    %19 = arith.mulf %18, %12 : vector<8x128xf32>
    %20 = vector.broadcast %16 : f32 to vector<8x128xf32>
    %21 = arith.mulf %20, %3 : vector<8x128xf32>
    %22 = arith.addf %19, %21 : vector<8x128xf32>
    %c0_16 = arith.constant 0 : index
    %c0_17 = arith.constant 0 : index
    %c0_18 = arith.constant 0 : index
    %23 = vector.load %arg7[%c0_16, %c0_17, %c0_18] : memref<8x8x128xf32, #tpu.memory_space<vmem>>, vector<1x8x128xf32>
    %24 = vector.shape_cast %23 : vector<1x8x128xf32> to vector<8x128xf32>
    %25 = vector.shape_cast %22 : vector<8x128xf32> to vector<1x8x128xf32>
    tpu.vector_store %arg7[%c0_16, %c0_17, %c0_18], %25 {strides = array<i32>} : memref<8x8x128xf32, #tpu.memory_space<vmem>>, vector<1x8x128xf32>,
    %c8_i32_19 = arith.constant 8 : i32
    %26 = arith.muli %arg1, %c8_i32_19 : i32
    %c0_i32_20 = arith.constant 0 : i32
    %27 = arith.addi %26, %c0_i32_20 : i32
    %28 = vector.broadcast %27 : i32 to vector<8x1xi32>
    %29 = arith.cmpi slt, %28, %4 : vector<8x1xi32>
    %30 = arith.extui %29 : vector<8x1xi1> to vector<8x1xi32>
    %31 = arith.sitofp %30 : vector<8x1xi32> to vector<8x1xf32>
    %c0_21 = arith.constant 0 : index
    %c0_22 = arith.constant 0 : index
    %32 = vector.load %arg8[%c0_21, %c0_22] : memref<8x128xf32, #tpu.memory_space<vmem>>, vector<8x128xf32>
    %33 = vector.broadcast %31 : vector<8x1xf32> to vector<8x128xf32>
    %34 = arith.mulf %22, %33 : vector<8x128xf32>
    %35 = arith.addf %32, %34 : vector<8x128xf32>
    %c0_23 = arith.constant 0 : index
    %c0_24 = arith.constant 0 : index
    %36 = vector.load %arg8[%c0_23, %c0_24] : memref<8x128xf32, #tpu.memory_space<vmem>>, vector<8x128xf32>
    tpu.vector_store %arg8[%c0_23, %c0_24], %35 {strides = array<i32>} : memref<8x128xf32, #tpu.memory_space<vmem>>, vector<8x128xf32>,
    %c1 = arith.constant 1 : index
    %c0_25 = arith.constant 0 : index
    %c0_26 = arith.constant 0 : index
    %37 = vector.load %arg4[%c1, %c0_25, %c0_26] : memref<8x8x32xf32, #tpu.memory_space<vmem>>, vector<1x8x32xf32>
    %38 = vector.shape_cast %37 : vector<1x8x32xf32> to vector<8x32xf32>
    %c0_27 = arith.constant 0 : index
    %c0_28 = arith.constant 0 : index
    %39 = vector.load %arg5[%c0_27, %c0_28] : memref<32x128xf32, #tpu.memory_space<vmem>>, vector<32x128xf32>
    %cst_29 = arith.constant dense<0.000000e+00> : vector<8x128xf32>
    %40 = tpu.matmul %38, %39, %cst_29 {dimension_numbers = #tpu.dot_dimension_numbers<[1], [0], [0], [1], [0, 0, 1, 1], [], []>} : vector<8x32xf32>, vector<32x128xf32>, vector<8x128xf32> -> vector<8x128xf32>
    %c0_30 = arith.constant 0 : index
    %c0_31 = arith.constant 0 : index
    %41 = vector.load %arg6[%c0_30, %c0_31] : memref<128x128xf32, #tpu.memory_space<vmem>>, vector<128x128xf32>
    %cst_32 = arith.constant dense<0.000000e+00> : vector<8x128xf32>
    %42 = tpu.matmul %22, %41, %cst_32 {dimension_numbers = #tpu.dot_dimension_numbers<[1], [0], [0], [1], [0, 0, 1, 1], [], []>} : vector<8x128xf32>, vector<128x128xf32>, vector<8x128xf32> -> vector<8x128xf32>
    %43 = arith.addf %40, %42 : vector<8x128xf32>
    %44 = math.tanh %43 : vector<8x128xf32>
    %c8_i32_33 = arith.constant 8 : i32
    %45 = arith.muli %arg1, %c8_i32_33 : i32
    %c1_i32_34 = arith.constant 1 : i32
    %46 = arith.addi %45, %c1_i32_34 : i32
    %c1_i32_35 = arith.constant 1 : i32
    %47 = arith.cmpi sgt, %46, %c1_i32_35 : i32
    %cst_36 = arith.constant 2.000000e-01 : f32
    %cst_37 = arith.constant 0.000000e+00 : f32
    %48 = arith.select %47, %cst_36, %cst_37 : f32
    %cst_38 = arith.constant 1.000000e+00 : f32
    %49 = arith.subf %cst_38, %48 : f32
    %50 = vector.broadcast %49 : f32 to vector<8x128xf32>
    %51 = arith.mulf %50, %44 : vector<8x128xf32>
    %52 = vector.broadcast %48 : f32 to vector<8x128xf32>
    %53 = arith.mulf %52, %22 : vector<8x128xf32>
    %54 = arith.addf %51, %53 : vector<8x128xf32>
    %c1_39 = arith.constant 1 : index
    %c0_40 = arith.constant 0 : index
    %c0_41 = arith.constant 0 : index
    %55 = vector.load %arg7[%c1_39, %c0_40, %c0_41] : memref<8x8x128xf32, #tpu.memory_space<vmem>>, vector<1x8x128xf32>
    %56 = vector.shape_cast %55 : vector<1x8x128xf32> to vector<8x128xf32>
    %57 = vector.shape_cast %54 : vector<8x128xf32> to vector<1x8x128xf32>
    tpu.vector_store %arg7[%c1_39, %c0_40, %c0_41], %57 {strides = array<i32>} : memref<8x8x128xf32, #tpu.memory_space<vmem>>, vector<1x8x128xf32>,
    %c8_i32_42 = arith.constant 8 : i32
    %58 = arith.muli %arg1, %c8_i32_42 : i32
    %c1_i32_43 = arith.constant 1 : i32
    %59 = arith.addi %58, %c1_i32_43 : i32
    %60 = vector.broadcast %59 : i32 to vector<8x1xi32>
    %61 = arith.cmpi slt, %60, %4 : vector<8x1xi32>
    %62 = arith.extui %61 : vector<8x1xi1> to vector<8x1xi32>
    %63 = arith.sitofp %62 : vector<8x1xi32> to vector<8x1xf32>
    %c0_44 = arith.constant 0 : index
    %c0_45 = arith.constant 0 : index
    %64 = vector.load %arg8[%c0_44, %c0_45] : memref<8x128xf32, #tpu.memory_space<vmem>>, vector<8x128xf32>
    %65 = vector.broadcast %63 : vector<8x1xf32> to vector<8x128xf32>
    %66 = arith.mulf %54, %65 : vector<8x128xf32>
    %67 = arith.addf %64, %66 : vector<8x128xf32>
    %c0_46 = arith.constant 0 : index
    %c0_47 = arith.constant 0 : index
    %68 = vector.load %arg8[%c0_46, %c0_47] : memref<8x128xf32, #tpu.memory_space<vmem>>, vector<8x128xf32>
    tpu.vector_store %arg8[%c0_46, %c0_47], %67 {strides = array<i32>} : memref<8x128xf32, #tpu.memory_space<vmem>>, vector<8x128xf32>,
    %c2 = arith.constant 2 : index
    %c0_48 = arith.constant 0 : index
    %c0_49 = arith.constant 0 : index
    %69 = vector.load %arg4[%c2, %c0_48, %c0_49] : memref<8x8x32xf32, #tpu.memory_space<vmem>>, vector<1x8x32xf32>
    %70 = vector.shape_cast %69 : vector<1x8x32xf32> to vector<8x32xf32>
    %c0_50 = arith.constant 0 : index
    %c0_51 = arith.constant 0 : index
    %71 = vector.load %arg5[%c0_50, %c0_51] : memref<32x128xf32, #tpu.memory_space<vmem>>, vector<32x128xf32>
    %cst_52 = arith.constant dense<0.000000e+00> : vector<8x128xf32>
    %72 = tpu.matmul %70, %71, %cst_52 {dimension_numbers = #tpu.dot_dimension_numbers<[1], [0], [0], [1], [0, 0, 1, 1], [], []>} : vector<8x32xf32>, vector<32x128xf32>, vector<8x128xf32> -> vector<8x128xf32>
    %c0_53 = arith.constant 0 : index
    %c0_54 = arith.constant 0 : index
    %73 = vector.load %arg6[%c0_53, %c0_54] : memref<128x128xf32, #tpu.memory_space<vmem>>, vector<128x128xf32>
    %cst_55 = arith.constant dense<0.000000e+00> : vector<8x128xf32>
    %74 = tpu.matmul %54, %73, %cst_55 {dimension_numbers = #tpu.dot_dimension_numbers<[1], [0], [0], [1], [0, 0, 1, 1], [], []>} : vector<8x128xf32>, vector<128x128xf32>, vector<8x128xf32> -> vector<8x128xf32>
    %75 = arith.addf %72, %74 : vector<8x128xf32>
    %76 = math.tanh %75 : vector<8x128xf32>
    %cst_56 = arith.constant 8.000000e-01 : f32
    %77 = vector.broadcast %cst_56 : f32 to vector<8x128xf32>
    %78 = arith.mulf %77, %76 : vector<8x128xf32>
    %cst_57 = arith.constant 2.000000e-01 : f32
    %79 = vector.broadcast %cst_57 : f32 to vector<8x128xf32>
    %80 = arith.mulf %79, %54 : vector<8x128xf32>
    %81 = arith.addf %78, %80 : vector<8x128xf32>
    %c2_58 = arith.constant 2 : index
    %c0_59 = arith.constant 0 : index
    %c0_60 = arith.constant 0 : index
    %82 = vector.load %arg7[%c2_58, %c0_59, %c0_60] : memref<8x8x128xf32, #tpu.memory_space<vmem>>, vector<1x8x128xf32>
    %83 = vector.shape_cast %82 : vector<1x8x128xf32> to vector<8x128xf32>
    %84 = vector.shape_cast %81 : vector<8x128xf32> to vector<1x8x128xf32>
    tpu.vector_store %arg7[%c2_58, %c0_59, %c0_60], %84 {strides = array<i32>} : memref<8x8x128xf32, #tpu.memory_space<vmem>>, vector<1x8x128xf32>,
    %c8_i32_61 = arith.constant 8 : i32
    %85 = arith.muli %arg1, %c8_i32_61 : i32
    %c2_i32 = arith.constant 2 : i32
    %86 = arith.addi %85, %c2_i32 : i32
    %87 = vector.broadcast %86 : i32 to vector<8x1xi32>
    %88 = arith.cmpi slt, %87, %4 : vector<8x1xi32>
    %89 = arith.extui %88 : vector<8x1xi1> to vector<8x1xi32>
    %90 = arith.sitofp %89 : vector<8x1xi32> to vector<8x1xf32>
    %c0_62 = arith.constant 0 : index
    %c0_63 = arith.constant 0 : index
    %91 = vector.load %arg8[%c0_62, %c0_63] : memref<8x128xf32, #tpu.memory_space<vmem>>, vector<8x128xf32>
    %92 = vector.broadcast %90 : vector<8x1xf32> to vector<8x128xf32>
    %93 = arith.mulf %81, %92 : vector<8x128xf32>
    %94 = arith.addf %91, %93 : vector<8x128xf32>
    %c0_64 = arith.constant 0 : index
    %c0_65 = arith.constant 0 : index
    %95 = vector.load %arg8[%c0_64, %c0_65] : memref<8x128xf32, #tpu.memory_space<vmem>>, vector<8x128xf32>
    tpu.vector_store %arg8[%c0_64, %c0_65], %94 {strides = array<i32>} : memref<8x128xf32, #tpu.memory_space<vmem>>, vector<8x128xf32>,
    %c3 = arith.constant 3 : index
    %c0_66 = arith.constant 0 : index
    %c0_67 = arith.constant 0 : index
    %96 = vector.load %arg4[%c3, %c0_66, %c0_67] : memref<8x8x32xf32, #tpu.memory_space<vmem>>, vector<1x8x32xf32>
    %97 = vector.shape_cast %96 : vector<1x8x32xf32> to vector<8x32xf32>
    %c0_68 = arith.constant 0 : index
    %c0_69 = arith.constant 0 : index
    %98 = vector.load %arg5[%c0_68, %c0_69] : memref<32x128xf32, #tpu.memory_space<vmem>>, vector<32x128xf32>
    %cst_70 = arith.constant dense<0.000000e+00> : vector<8x128xf32>
    %99 = tpu.matmul %97, %98, %cst_70 {dimension_numbers = #tpu.dot_dimension_numbers<[1], [0], [0], [1], [0, 0, 1, 1], [], []>} : vector<8x32xf32>, vector<32x128xf32>, vector<8x128xf32> -> vector<8x128xf32>
    %c0_71 = arith.constant 0 : index
    %c0_72 = arith.constant 0 : index
    %100 = vector.load %arg6[%c0_71, %c0_72] : memref<128x128xf32, #tpu.memory_space<vmem>>, vector<128x128xf32>
    %cst_73 = arith.constant dense<0.000000e+00> : vector<8x128xf32>
    %101 = tpu.matmul %81, %100, %cst_73 {dimension_numbers = #tpu.dot_dimension_numbers<[1], [0], [0], [1], [0, 0, 1, 1], [], []>} : vector<8x128xf32>, vector<128x128xf32>, vector<8x128xf32> -> vector<8x128xf32>
    %102 = arith.addf %99, %101 : vector<8x128xf32>
    %103 = math.tanh %102 : vector<8x128xf32>
    %cst_74 = arith.constant 8.000000e-01 : f32
    %104 = vector.broadcast %cst_74 : f32 to vector<8x128xf32>
    %105 = arith.mulf %104, %103 : vector<8x128xf32>
    %cst_75 = arith.constant 2.000000e-01 : f32
    %106 = vector.broadcast %cst_75 : f32 to vector<8x128xf32>
    %107 = arith.mulf %106, %81 : vector<8x128xf32>
    %108 = arith.addf %105, %107 : vector<8x128xf32>
    %c3_76 = arith.constant 3 : index
    %c0_77 = arith.constant 0 : index
    %c0_78 = arith.constant 0 : index
    %109 = vector.load %arg7[%c3_76, %c0_77, %c0_78] : memref<8x8x128xf32, #tpu.memory_space<vmem>>, vector<1x8x128xf32>
    %110 = vector.shape_cast %109 : vector<1x8x128xf32> to vector<8x128xf32>
    %111 = vector.shape_cast %108 : vector<8x128xf32> to vector<1x8x128xf32>
    tpu.vector_store %arg7[%c3_76, %c0_77, %c0_78], %111 {strides = array<i32>} : memref<8x8x128xf32, #tpu.memory_space<vmem>>, vector<1x8x128xf32>,
    %c8_i32_79 = arith.constant 8 : i32
    %112 = arith.muli %arg1, %c8_i32_79 : i32
    %c3_i32 = arith.constant 3 : i32
    %113 = arith.addi %112, %c3_i32 : i32
    %114 = vector.broadcast %113 : i32 to vector<8x1xi32>
    %115 = arith.cmpi slt, %114, %4 : vector<8x1xi32>
    %116 = arith.extui %115 : vector<8x1xi1> to vector<8x1xi32>
    %117 = arith.sitofp %116 : vector<8x1xi32> to vector<8x1xf32>
    %c0_80 = arith.constant 0 : index
    %c0_81 = arith.constant 0 : index
    %118 = vector.load %arg8[%c0_80, %c0_81] : memref<8x128xf32, #tpu.memory_space<vmem>>, vector<8x128xf32>
    %119 = vector.broadcast %117 : vector<8x1xf32> to vector<8x128xf32>
    %120 = arith.mulf %108, %119 : vector<8x128xf32>
    %121 = arith.addf %118, %120 : vector<8x128xf32>
    %c0_82 = arith.constant 0 : index
    %c0_83 = arith.constant 0 : index
    %122 = vector.load %arg8[%c0_82, %c0_83] : memref<8x128xf32, #tpu.memory_space<vmem>>, vector<8x128xf32>
    tpu.vector_store %arg8[%c0_82, %c0_83], %121 {strides = array<i32>} : memref<8x128xf32, #tpu.memory_space<vmem>>, vector<8x128xf32>,
    %c4 = arith.constant 4 : index
    %c0_84 = arith.constant 0 : index
    %c0_85 = arith.constant 0 : index
    %123 = vector.load %arg4[%c4, %c0_84, %c0_85] : memref<8x8x32xf32, #tpu.memory_space<vmem>>, vector<1x8x32xf32>
    %124 = vector.shape_cast %123 : vector<1x8x32xf32> to vector<8x32xf32>
    %c0_86 = arith.constant 0 : index
    %c0_87 = arith.constant 0 : index
    %125 = vector.load %arg5[%c0_86, %c0_87] : memref<32x128xf32, #tpu.memory_space<vmem>>, vector<32x128xf32>
    %cst_88 = arith.constant dense<0.000000e+00> : vector<8x128xf32>
    %126 = tpu.matmul %124, %125, %cst_88 {dimension_numbers = #tpu.dot_dimension_numbers<[1], [0], [0], [1], [0, 0, 1, 1], [], []>} : vector<8x32xf32>, vector<32x128xf32>, vector<8x128xf32> -> vector<8x128xf32>
    %c0_89 = arith.constant 0 : index
    %c0_90 = arith.constant 0 : index
    %127 = vector.load %arg6[%c0_89, %c0_90] : memref<128x128xf32, #tpu.memory_space<vmem>>, vector<128x128xf32>
    %cst_91 = arith.constant dense<0.000000e+00> : vector<8x128xf32>
    %128 = tpu.matmul %108, %127, %cst_91 {dimension_numbers = #tpu.dot_dimension_numbers<[1], [0], [0], [1], [0, 0, 1, 1], [], []>} : vector<8x128xf32>, vector<128x128xf32>, vector<8x128xf32> -> vector<8x128xf32>
    %129 = arith.addf %126, %128 : vector<8x128xf32>
    %130 = math.tanh %129 : vector<8x128xf32>
    %cst_92 = arith.constant 8.000000e-01 : f32
    %131 = vector.broadcast %cst_92 : f32 to vector<8x128xf32>
    %132 = arith.mulf %131, %130 : vector<8x128xf32>
    %cst_93 = arith.constant 2.000000e-01 : f32
    %133 = vector.broadcast %cst_93 : f32 to vector<8x128xf32>
    %134 = arith.mulf %133, %108 : vector<8x128xf32>
    %135 = arith.addf %132, %134 : vector<8x128xf32>
    %c4_94 = arith.constant 4 : index
    %c0_95 = arith.constant 0 : index
    %c0_96 = arith.constant 0 : index
    %136 = vector.load %arg7[%c4_94, %c0_95, %c0_96] : memref<8x8x128xf32, #tpu.memory_space<vmem>>, vector<1x8x128xf32>
    %137 = vector.shape_cast %136 : vector<1x8x128xf32> to vector<8x128xf32>
    %138 = vector.shape_cast %135 : vector<8x128xf32> to vector<1x8x128xf32>
    tpu.vector_store %arg7[%c4_94, %c0_95, %c0_96], %138 {strides = array<i32>} : memref<8x8x128xf32, #tpu.memory_space<vmem>>, vector<1x8x128xf32>,
    %c8_i32_97 = arith.constant 8 : i32
    %139 = arith.muli %arg1, %c8_i32_97 : i32
    %c4_i32 = arith.constant 4 : i32
    %140 = arith.addi %139, %c4_i32 : i32
    %141 = vector.broadcast %140 : i32 to vector<8x1xi32>
    %142 = arith.cmpi slt, %141, %4 : vector<8x1xi32>
    %143 = arith.extui %142 : vector<8x1xi1> to vector<8x1xi32>
    %144 = arith.sitofp %143 : vector<8x1xi32> to vector<8x1xf32>
    %c0_98 = arith.constant 0 : index
    %c0_99 = arith.constant 0 : index
    %145 = vector.load %arg8[%c0_98, %c0_99] : memref<8x128xf32, #tpu.memory_space<vmem>>, vector<8x128xf32>
    %146 = vector.broadcast %144 : vector<8x1xf32> to vector<8x128xf32>
    %147 = arith.mulf %135, %146 : vector<8x128xf32>
    %148 = arith.addf %145, %147 : vector<8x128xf32>
    %c0_100 = arith.constant 0 : index
    %c0_101 = arith.constant 0 : index
    %149 = vector.load %arg8[%c0_100, %c0_101] : memref<8x128xf32, #tpu.memory_space<vmem>>, vector<8x128xf32>
    tpu.vector_store %arg8[%c0_100, %c0_101], %148 {strides = array<i32>} : memref<8x128xf32, #tpu.memory_space<vmem>>, vector<8x128xf32>,
    %c5 = arith.constant 5 : index
    %c0_102 = arith.constant 0 : index
    %c0_103 = arith.constant 0 : index
    %150 = vector.load %arg4[%c5, %c0_102, %c0_103] : memref<8x8x32xf32, #tpu.memory_space<vmem>>, vector<1x8x32xf32>
    %151 = vector.shape_cast %150 : vector<1x8x32xf32> to vector<8x32xf32>
    %c0_104 = arith.constant 0 : index
    %c0_105 = arith.constant 0 : index
    %152 = vector.load %arg5[%c0_104, %c0_105] : memref<32x128xf32, #tpu.memory_space<vmem>>, vector<32x128xf32>
    %cst_106 = arith.constant dense<0.000000e+00> : vector<8x128xf32>
    %153 = tpu.matmul %151, %152, %cst_106 {dimension_numbers = #tpu.dot_dimension_numbers<[1], [0], [0], [1], [0, 0, 1, 1], [], []>} : vector<8x32xf32>, vector<32x128xf32>, vector<8x128xf32> -> vector<8x128xf32>
    %c0_107 = arith.constant 0 : index
    %c0_108 = arith.constant 0 : index
    %154 = vector.load %arg6[%c0_107, %c0_108] : memref<128x128xf32, #tpu.memory_space<vmem>>, vector<128x128xf32>
    %cst_109 = arith.constant dense<0.000000e+00> : vector<8x128xf32>
    %155 = tpu.matmul %135, %154, %cst_109 {dimension_numbers = #tpu.dot_dimension_numbers<[1], [0], [0], [1], [0, 0, 1, 1], [], []>} : vector<8x128xf32>, vector<128x128xf32>, vector<8x128xf32> -> vector<8x128xf32>
    %156 = arith.addf %153, %155 : vector<8x128xf32>
    %157 = math.tanh %156 : vector<8x128xf32>
    %cst_110 = arith.constant 8.000000e-01 : f32
    %158 = vector.broadcast %cst_110 : f32 to vector<8x128xf32>
    %159 = arith.mulf %158, %157 : vector<8x128xf32>
    %cst_111 = arith.constant 2.000000e-01 : f32
    %160 = vector.broadcast %cst_111 : f32 to vector<8x128xf32>
    %161 = arith.mulf %160, %135 : vector<8x128xf32>
    %162 = arith.addf %159, %161 : vector<8x128xf32>
    %c5_112 = arith.constant 5 : index
    %c0_113 = arith.constant 0 : index
    %c0_114 = arith.constant 0 : index
    %163 = vector.load %arg7[%c5_112, %c0_113, %c0_114] : memref<8x8x128xf32, #tpu.memory_space<vmem>>, vector<1x8x128xf32>
    %164 = vector.shape_cast %163 : vector<1x8x128xf32> to vector<8x128xf32>
    %165 = vector.shape_cast %162 : vector<8x128xf32> to vector<1x8x128xf32>
    tpu.vector_store %arg7[%c5_112, %c0_113, %c0_114], %165 {strides = array<i32>} : memref<8x8x128xf32, #tpu.memory_space<vmem>>, vector<1x8x128xf32>,
    %c8_i32_115 = arith.constant 8 : i32
    %166 = arith.muli %arg1, %c8_i32_115 : i32
    %c5_i32 = arith.constant 5 : i32
    %167 = arith.addi %166, %c5_i32 : i32
    %168 = vector.broadcast %167 : i32 to vector<8x1xi32>
    %169 = arith.cmpi slt, %168, %4 : vector<8x1xi32>
    %170 = arith.extui %169 : vector<8x1xi1> to vector<8x1xi32>
    %171 = arith.sitofp %170 : vector<8x1xi32> to vector<8x1xf32>
    %c0_116 = arith.constant 0 : index
    %c0_117 = arith.constant 0 : index
    %172 = vector.load %arg8[%c0_116, %c0_117] : memref<8x128xf32, #tpu.memory_space<vmem>>, vector<8x128xf32>
    %173 = vector.broadcast %171 : vector<8x1xf32> to vector<8x128xf32>
    %174 = arith.mulf %162, %173 : vector<8x128xf32>
    %175 = arith.addf %172, %174 : vector<8x128xf32>
    %c0_118 = arith.constant 0 : index
    %c0_119 = arith.constant 0 : index
    %176 = vector.load %arg8[%c0_118, %c0_119] : memref<8x128xf32, #tpu.memory_space<vmem>>, vector<8x128xf32>
    tpu.vector_store %arg8[%c0_118, %c0_119], %175 {strides = array<i32>} : memref<8x128xf32, #tpu.memory_space<vmem>>, vector<8x128xf32>,
    %c6 = arith.constant 6 : index
    %c0_120 = arith.constant 0 : index
    %c0_121 = arith.constant 0 : index
    %177 = vector.load %arg4[%c6, %c0_120, %c0_121] : memref<8x8x32xf32, #tpu.memory_space<vmem>>, vector<1x8x32xf32>
    %178 = vector.shape_cast %177 : vector<1x8x32xf32> to vector<8x32xf32>
    %c0_122 = arith.constant 0 : index
    %c0_123 = arith.constant 0 : index
    %179 = vector.load %arg5[%c0_122, %c0_123] : memref<32x128xf32, #tpu.memory_space<vmem>>, vector<32x128xf32>
    %cst_124 = arith.constant dense<0.000000e+00> : vector<8x128xf32>
    %180 = tpu.matmul %178, %179, %cst_124 {dimension_numbers = #tpu.dot_dimension_numbers<[1], [0], [0], [1], [0, 0, 1, 1], [], []>} : vector<8x32xf32>, vector<32x128xf32>, vector<8x128xf32> -> vector<8x128xf32>
    %c0_125 = arith.constant 0 : index
    %c0_126 = arith.constant 0 : index
    %181 = vector.load %arg6[%c0_125, %c0_126] : memref<128x128xf32, #tpu.memory_space<vmem>>, vector<128x128xf32>
    %cst_127 = arith.constant dense<0.000000e+00> : vector<8x128xf32>
    %182 = tpu.matmul %162, %181, %cst_127 {dimension_numbers = #tpu.dot_dimension_numbers<[1], [0], [0], [1], [0, 0, 1, 1], [], []>} : vector<8x128xf32>, vector<128x128xf32>, vector<8x128xf32> -> vector<8x128xf32>
    %183 = arith.addf %180, %182 : vector<8x128xf32>
    %184 = math.tanh %183 : vector<8x128xf32>
    %cst_128 = arith.constant 8.000000e-01 : f32
    %185 = vector.broadcast %cst_128 : f32 to vector<8x128xf32>
    %186 = arith.mulf %185, %184 : vector<8x128xf32>
    %cst_129 = arith.constant 2.000000e-01 : f32
    %187 = vector.broadcast %cst_129 : f32 to vector<8x128xf32>
    %188 = arith.mulf %187, %162 : vector<8x128xf32>
    %189 = arith.addf %186, %188 : vector<8x128xf32>
    %c6_130 = arith.constant 6 : index
    %c0_131 = arith.constant 0 : index
    %c0_132 = arith.constant 0 : index
    %190 = vector.load %arg7[%c6_130, %c0_131, %c0_132] : memref<8x8x128xf32, #tpu.memory_space<vmem>>, vector<1x8x128xf32>
    %191 = vector.shape_cast %190 : vector<1x8x128xf32> to vector<8x128xf32>
    %192 = vector.shape_cast %189 : vector<8x128xf32> to vector<1x8x128xf32>
    tpu.vector_store %arg7[%c6_130, %c0_131, %c0_132], %192 {strides = array<i32>} : memref<8x8x128xf32, #tpu.memory_space<vmem>>, vector<1x8x128xf32>,
    %c8_i32_133 = arith.constant 8 : i32
    %193 = arith.muli %arg1, %c8_i32_133 : i32
    %c6_i32 = arith.constant 6 : i32
    %194 = arith.addi %193, %c6_i32 : i32
    %195 = vector.broadcast %194 : i32 to vector<8x1xi32>
    %196 = arith.cmpi slt, %195, %4 : vector<8x1xi32>
    %197 = arith.extui %196 : vector<8x1xi1> to vector<8x1xi32>
    %198 = arith.sitofp %197 : vector<8x1xi32> to vector<8x1xf32>
    %c0_134 = arith.constant 0 : index
    %c0_135 = arith.constant 0 : index
    %199 = vector.load %arg8[%c0_134, %c0_135] : memref<8x128xf32, #tpu.memory_space<vmem>>, vector<8x128xf32>
    %200 = vector.broadcast %198 : vector<8x1xf32> to vector<8x128xf32>
    %201 = arith.mulf %189, %200 : vector<8x128xf32>
    %202 = arith.addf %199, %201 : vector<8x128xf32>
    %c0_136 = arith.constant 0 : index
    %c0_137 = arith.constant 0 : index
    %203 = vector.load %arg8[%c0_136, %c0_137] : memref<8x128xf32, #tpu.memory_space<vmem>>, vector<8x128xf32>
    tpu.vector_store %arg8[%c0_136, %c0_137], %202 {strides = array<i32>} : memref<8x128xf32, #tpu.memory_space<vmem>>, vector<8x128xf32>,
    %c7 = arith.constant 7 : index
    %c0_138 = arith.constant 0 : index
    %c0_139 = arith.constant 0 : index
    %204 = vector.load %arg4[%c7, %c0_138, %c0_139] : memref<8x8x32xf32, #tpu.memory_space<vmem>>, vector<1x8x32xf32>
    %205 = vector.shape_cast %204 : vector<1x8x32xf32> to vector<8x32xf32>
    %c0_140 = arith.constant 0 : index
    %c0_141 = arith.constant 0 : index
    %206 = vector.load %arg5[%c0_140, %c0_141] : memref<32x128xf32, #tpu.memory_space<vmem>>, vector<32x128xf32>
    %cst_142 = arith.constant dense<0.000000e+00> : vector<8x128xf32>
    %207 = tpu.matmul %205, %206, %cst_142 {dimension_numbers = #tpu.dot_dimension_numbers<[1], [0], [0], [1], [0, 0, 1, 1], [], []>} : vector<8x32xf32>, vector<32x128xf32>, vector<8x128xf32> -> vector<8x128xf32>
    %c0_143 = arith.constant 0 : index
    %c0_144 = arith.constant 0 : index
    %208 = vector.load %arg6[%c0_143, %c0_144] : memref<128x128xf32, #tpu.memory_space<vmem>>, vector<128x128xf32>
    %cst_145 = arith.constant dense<0.000000e+00> : vector<8x128xf32>
    %209 = tpu.matmul %189, %208, %cst_145 {dimension_numbers = #tpu.dot_dimension_numbers<[1], [0], [0], [1], [0, 0, 1, 1], [], []>} : vector<8x128xf32>, vector<128x128xf32>, vector<8x128xf32> -> vector<8x128xf32>
    %210 = arith.addf %207, %209 : vector<8x128xf32>
    %211 = math.tanh %210 : vector<8x128xf32>
    %cst_146 = arith.constant 8.000000e-01 : f32
    %212 = vector.broadcast %cst_146 : f32 to vector<8x128xf32>
    %213 = arith.mulf %212, %211 : vector<8x128xf32>
    %cst_147 = arith.constant 2.000000e-01 : f32
    %214 = vector.broadcast %cst_147 : f32 to vector<8x128xf32>
    %215 = arith.mulf %214, %189 : vector<8x128xf32>
    %216 = arith.addf %213, %215 : vector<8x128xf32>
    %c7_148 = arith.constant 7 : index
    %c0_149 = arith.constant 0 : index
    %c0_150 = arith.constant 0 : index
    %217 = vector.load %arg7[%c7_148, %c0_149, %c0_150] : memref<8x8x128xf32, #tpu.memory_space<vmem>>, vector<1x8x128xf32>
    %218 = vector.shape_cast %217 : vector<1x8x128xf32> to vector<8x128xf32>
    %219 = vector.shape_cast %216 : vector<8x128xf32> to vector<1x8x128xf32>
    tpu.vector_store %arg7[%c7_148, %c0_149, %c0_150], %219 {strides = array<i32>} : memref<8x8x128xf32, #tpu.memory_space<vmem>>, vector<1x8x128xf32>,
    %c8_i32_151 = arith.constant 8 : i32
    %220 = arith.muli %arg1, %c8_i32_151 : i32
    %c7_i32 = arith.constant 7 : i32
    %221 = arith.addi %220, %c7_i32 : i32
    %222 = vector.broadcast %221 : i32 to vector<8x1xi32>
    %223 = arith.cmpi slt, %222, %4 : vector<8x1xi32>
    %224 = arith.extui %223 : vector<8x1xi1> to vector<8x1xi32>
    %225 = arith.sitofp %224 : vector<8x1xi32> to vector<8x1xf32>
    %c0_152 = arith.constant 0 : index
    %c0_153 = arith.constant 0 : index
    %226 = vector.load %arg8[%c0_152, %c0_153] : memref<8x128xf32, #tpu.memory_space<vmem>>, vector<8x128xf32>
    %227 = vector.broadcast %225 : vector<8x1xf32> to vector<8x128xf32>
    %228 = arith.mulf %216, %227 : vector<8x128xf32>
    %229 = arith.addf %226, %228 : vector<8x128xf32>
    %c0_154 = arith.constant 0 : index
    %c0_155 = arith.constant 0 : index
    %230 = vector.load %arg8[%c0_154, %c0_155] : memref<8x128xf32, #tpu.memory_space<vmem>>, vector<8x128xf32>
    tpu.vector_store %arg8[%c0_154, %c0_155], %229 {strides = array<i32>} : memref<8x128xf32, #tpu.memory_space<vmem>>, vector<8x128xf32>,
    %c0_156 = arith.constant 0 : index
    %c0_157 = arith.constant 0 : index
    %231 = vector.load %arg9[%c0_156, %c0_157] : memref<8x128xf32, #tpu.memory_space<vmem>>, vector<8x128xf32>
    tpu.vector_store %arg9[%c0_156, %c0_157], %216 {strides = array<i32>} : memref<8x128xf32, #tpu.memory_space<vmem>>, vector<8x128xf32>,
    %c0_i32_158 = arith.constant 0 : i32
    %232 = arith.cmpi eq, %arg1, %c0_i32_158 : i32
    %233 = arith.extui %232 : i1 to i32
    %c0_i32_159 = arith.constant 0 : i32
    %234 = arith.cmpi ne, %233, %c0_i32_159 : i32
    scf.if %234 {
      %c0_160 = arith.constant 0 : index
      %c0_161 = arith.constant 0 : index
      %235 = vector.load %arg8[%c0_160, %c0_161] : memref<8x128xf32, #tpu.memory_space<vmem>>, vector<8x128xf32>
      %c0_162 = arith.constant 0 : index
      %c0_163 = arith.constant 0 : index
      %236 = vector.load %arg3[%c0_162, %c0_163] : memref<8x1xf32, #tpu.memory_space<vmem>>, vector<8x1xf32>
      %237 = vector.broadcast %236 : vector<8x1xf32> to vector<8x128xf32>
      %238 = arith.mulf %235, %237 : vector<8x128xf32>
      %c0_164 = arith.constant 0 : index
      %c0_165 = arith.constant 0 : index
      %239 = vector.load %arg8[%c0_164, %c0_165] : memref<8x128xf32, #tpu.memory_space<vmem>>, vector<8x128xf32>
      tpu.vector_store %arg8[%c0_164, %c0_165], %238 {strides = array<i32>} : memref<8x128xf32, #tpu.memory_space<vmem>>, vector<8x128xf32>,
    } else {
    }
    return
  }
  func.func @transform_0(%arg0: i32, %arg1: i32) -> (i32, i32) {
    %c0_i32 = arith.constant 0 : i32
    %c0_i32_0 = arith.constant 0 : i32
    return %arg0, %c0_i32 : i32, i32
  }
  func.func @transform_1(%arg0: i32, %arg1: i32) -> (i32, i32) {
    %c0_i32 = arith.constant 0 : i32
    %c0_i32_0 = arith.constant 0 : i32
    return %arg0, %c0_i32 : i32, i32
  }
  func.func @transform_2(%arg0: i32, %arg1: i32) -> (i32, i32, i32) {
    %c0_i32 = arith.constant 0 : i32
    %c0_i32_0 = arith.constant 0 : i32
    return %arg1, %arg0, %c0_i32 : i32, i32, i32
  }
  func.func @transform_3(%arg0: i32, %arg1: i32) -> (i32, i32) {
    %c0_i32 = arith.constant 0 : i32
    %c0_i32_0 = arith.constant 0 : i32
    %c0_i32_1 = arith.constant 0 : i32
    return %c0_i32, %c0_i32_0 : i32, i32
  }
  func.func @transform_4(%arg0: i32, %arg1: i32) -> (i32, i32) {
    %c0_i32 = arith.constant 0 : i32
    %c0_i32_0 = arith.constant 0 : i32
    %c0_i32_1 = arith.constant 0 : i32
    return %c0_i32, %c0_i32_0 : i32, i32
  }
  func.func @transform_5(%arg0: i32, %arg1: i32) -> (i32, i32, i32) {
    %c0_i32 = arith.constant 0 : i32
    %c0_i32_0 = arith.constant 0 : i32
    return %arg1, %arg0, %c0_i32 : i32, i32, i32
  }
  func.func @transform_6(%arg0: i32, %arg1: i32) -> (i32, i32) {
    %c0_i32 = arith.constant 0 : i32
    %c0_i32_0 = arith.constant 0 : i32
    return %arg0, %c0_i32 : i32, i32
  }
}

</mosaic_0001>

<bundles_post_ra>
// kernel: tpu_custom_call.1
= control target key start
LH: loop header
LB: loop body
LE: loop exit
PB: predicated region body
PF: predicated region fallthrough
CT: control target
= control target key end

     0   :  { %12 = vsyncpa [#allocation4], 0  ;;  %s2948_s0 = inlined_call_operand.vmem [shape: s32[8,1], index: 0, kind: input, shape index: {}]   ;;  %s2949_s1 = inlined_call_operand.vmem [shape: f32[8,1], index: 1, kind: input, shape index: {}]   ;;  %s2950_s2 = inlined_call_operand.hbm [shape: f32[8,8,32], index: 2, kind: input, shape index: {}]   ;;  %s2951_s3 = inlined_call_operand.hbm [shape: f32[32,128], index: 3, kind: input, shape index: {}]   ;;  %s2952_s4 = inlined_call_operand.hbm [shape: f32[128,128], index: 4, kind: input, shape index: {}]   ;;  %s2953_s5 = inlined_call_operand.hbm [shape: f32[8,8,128], index: 5, kind: output, shape index: {0}]   ;;  %s2954_s6 = inlined_call_operand.hbm [shape: f32[8,128], index: 6, kind: output, shape index: {1}]  }
   0x1   :  { %13 = vsyncpa [#allocation7], 0 }
   0x2   :  { %14 = vsyncpa [#allocation5], 0 }
   0x3   :  { %15 = vsyncpa [#allocation11], 0  ;;  %s2578_s21 = smov [#allocation6]   ;;  %s2579_s23 = smov [#allocation3]  }
   0x4   :  { %s37_s22 = sshll.u32 %s2578_s21, 4  ;;  %s25_s24 = sshll.u32 %s2579_s23, 4  ;;  %s38_s22 = int_to_ptr.vmem [resolvable:$true] %s37_s22  ;;  %s2624_s24 = int_to_ptr.vmem [resolvable:$true] %s25_s24 }
   0x5   :  { %s2460_s27 = scalar_lea.hbm %s2951_s3, 512 }
   0x6   :  { %p2461_p0 = scmp.ne.s32.totalorder %s2951_s3, %s2460_s27  ;;  %p2464_p1 = scmp.lt.u32.totalorder %s2460_s27, %s2951_s3 }
   0x8   :  { %p2466_p2 = pnand %p2464_p1, %p2461_p0 }
   0xa   :  { %2469 = shalt.err (!%p2466_p2)
}
   0xb   :  { %s2470_s8 = scalar_lea.vmem %s38_s22, 512  ;;  %p2475_p4 = scmp.lt.s32.totalorder %s38_s22, %s38_s22 }
   0xc   :  { %p2471_p3 = scmp.ne.s32.totalorder %s38_s22, %s2470_s8  ;;  %p2476_p5 = scmp.lt.s32.totalorder %s2470_s8, %s2470_s8 }
   0xe   :  { %p2477_p6 = por %p2476_p5, %p2475_p4 }
  0x10   :  { %p2478_p7 = pnand %p2477_p6, %p2471_p3 }
  0x12   :  { %2481 = shalt.err (!%p2478_p7)
}
  0x13   :  { %s2580_s9 = smov 128   ;;  %s2581_s10 = smov 8  }
  0x14   :  { %43 = dma.hbm_to_vmem [thread:$0]  %s2951_s3, 512, %s38_s22, [#allocation7], %s2580_s9, %s2580_s9, %s2581_s10  }
  0x15   :  { %s2482_s15 = scalar_lea.hbm %s2950_s2, 1024 }
  0x16   :  { %p2483_p8 = scmp.ne.s32.totalorder %s2950_s2, %s2482_s15  ;;  %p2486_p9 = scmp.lt.u32.totalorder %s2482_s15, %s2950_s2 }
  0x18   :  { %p2488_p10 = pnand %p2486_p9, %p2483_p8 }
  0x1a   :  { %2491 = shalt.err (!%p2488_p10)
}
  0x1b   :  { %s2492_s20 = scalar_lea.vmem %s2624_s24, 1024  ;;  %p2497_p12 = scmp.lt.s32.totalorder %s2624_s24, %s2624_s24 }
  0x1c   :  { %p2493_p11 = scmp.ne.s32.totalorder %s2624_s24, %s2492_s20  ;;  %p2498_p13 = scmp.lt.s32.totalorder %s2492_s20, %s2492_s20 }
  0x1e   :  { %p2499_p0 = por %p2498_p13, %p2497_p12 }
  0x20   :  { %p2500_p1 = pnand %p2499_p0, %p2493_p11 }
  0x22   :  { %2503 = shalt.err (!%p2500_p1)
}
  0x23   :  { %31 = dma.hbm_to_vmem [thread:$0]  %s2950_s2, 1024, %s2624_s24, [#allocation4], %s2580_s9, %s2580_s9, %s2581_s10  }
  0x24   :  { %s2582_s22 = smov [#allocation8]   ;;  %s2504_s27 = scalar_lea.hbm %s2952_s4, 2048 }
  0x25   :  { %s49_s23 = sshll.u32 %s2582_s22, 4  ;;  %p2505_p2 = scmp.ne.s32.totalorder %s2952_s4, %s2504_s27  ;;  %s50_s23 = int_to_ptr.vmem [resolvable:$true] %s49_s23 }
  0x26   :  { %p2508_p3 = scmp.lt.u32.totalorder %s2504_s27, %s2952_s4 }
  0x28   :  { %p2510_p4 = pnand %p2508_p3, %p2505_p2 }
  0x2a   :  { %2513 = shalt.err (!%p2510_p4)
}
  0x2b   :  { %s2514_s8 = scalar_lea.vmem %s50_s23, 2048  ;;  %p2519_p6 = scmp.lt.s32.totalorder %s50_s23, %s50_s23 }
  0x2c   :  { %p2515_p5 = scmp.ne.s32.totalorder %s50_s23, %s2514_s8  ;;  %p2520_p7 = scmp.lt.s32.totalorder %s2514_s8, %s2514_s8 }
  0x2e   :  { %p2521_p8 = por %p2520_p7, %p2519_p6 }
  0x30   :  { %p2522_p9 = pnand %p2521_p8, %p2515_p5 }
  0x32   :  { %2525 = shalt.err (!%p2522_p9)
}
  0x33   :  { %55 = dma.hbm_to_vmem [thread:$0]  %s2952_s4, 2048, %s50_s23, [#allocation7], %s2580_s9, %s2580_s9, %s2581_s10  }
  0x34   :  { %2570 = dma.done.wait [#allocation4], 1024  }
  0x35   :  { %2571 = vsyncadd [#allocation4], 4294966272 }
  0x36   :  { %2572 = dma.done.wait [#allocation7], 2560  }
  0x37   :  { %2573 = vsyncadd [#allocation7], 4294964736  ;;  %v2583_v0 = vmov 0.0|0.0   ;;  %vm2584_vm0 = vmmov 0   ;;  %v2585_v1 = vmov 0.0   ;;  %v2586_v2 = vmov 0  }
  0x38   :  { %2175 = vmatprep.subr.bf16.mxu0 %v2583_v0  ;;  %1839 = vmatprep.mubr.msk.f32.mxu0 %vm2584_vm0, %v2585_v1  ;;  %v78_v3 = vld [vmem:[#allocation8] sm:$0xff]  ;;  %v79_v4 = vld [vmem:[#allocation8 + $0x8] sm:$0xff]  ;;  %v80_v5 = vld [vmem:[#allocation8 + $0x10] sm:$0xff]  ;;  %vm164_vm2 = vcmask 261120   ;;  %s2588_s14 = smov [#allocation10]  }
  0x39   :  { %2442 = vset.pattern.permute.xlu0 %v2586_v2  ;;  %2205 = vmatprep.subr.bf16.mxu1 %v2583_v0  ;;  %v2682_v6 = vpack.c.bf16 %v79_v4, %v78_v3  ;;  %v81_v7 = vld [vmem:[#allocation8 + $0x18] sm:$0xff]  ;;  %v82_v9 = vld [vmem:[#allocation8 + $0x20] sm:$0xff]  ;;  %v83_v10 = vld [vmem:[#allocation8 + $0x28] sm:$0xff]  ;;  %s1593_s15 = sshll.u32 %s2588_s14, 4  ;;  %s1594_s15 = int_to_ptr.vmem [resolvable:$true] %s1593_s15 }
  0x3a   :  { %1885 = vmatprep.mubr.msk.f32.mxu1 %vm2584_vm0, %v2585_v1  ;;  %2443 = vset.pattern.permute.xlu1 %v2586_v2  ;;  %v2685_v8 = vpack.c.bf16 %v81_v7, %v80_v5  ;;  %v2691_v11 = vpack.c.bf16 %v83_v10, %v82_v9  ;;  %v2696_v12 = vld [vmem:[%s2948_s0] sm:$0xff]  ;;  %v84_v13 = vld [vmem:[#allocation8 + $0x30] sm:$0xff]  ;;  %v86_v17 = vld [vmem:[#allocation8 + $0x40] sm:$0xff] }
  0x3b   :  { %2177 = vmatpush3.bf16.msra.mxu0 %v2682_v6  ;;  %2207 = vmatpush3.bf16.msra.mxu1 %v2682_v6  ;;  %v85_v14 = vld [vmem:[#allocation8 + $0x38] sm:$0xff]  ;;  %vm1608_vm1 = vcmp.gt.s32.totalorder %v2696_v12, 0  ;;  %v87_v18 = vld [vmem:[#allocation8 + $0x48] sm:$0xff]  ;;  %v88_v20 = vld [vmem:[#allocation8 + $0x50] sm:$0xff]  ;;  %vm1611_vm3 = vcmp.gt.s32.totalorder %v2696_v12, 1  ;;  %vm1614_vm4 = vcmp.gt.s32.totalorder %v2696_v12, 2 }
  0x3c   :  { %2178 = vmatprep.subr.bf16.mxu0 %v2583_v0  ;;  %2208 = vmatprep.subr.bf16.mxu1 %v2583_v0  ;;  %v1609_v15 = vsel %vm1608_vm1, 1.0, %v2585_v1  ;;  %v2704_v16 = vpack.c.bf16 %v85_v14, %v84_v13  ;;  %v2710_v19 = vpack.c.bf16 %v87_v18, %v86_v17  ;;  %v89_v21 = vld [vmem:[#allocation8 + $0x58] sm:$0xff]  ;;  %v90_v23 = vld [vmem:[#allocation8 + $0x60] sm:$0xff]  ;;  %v91_v24 = vld [vmem:[#allocation8 + $0x68] sm:$0xff]  ;;  %v1612_v36 = vsel %vm1611_vm3, 1.0, %v2585_v1 }
  0x3d   :  { %256 = vperm.xlu0 %2442, %v1609_v15   ;;  %v2716_v22 = vpack.c.bf16 %v89_v21, %v88_v20  ;;  %v2722_v25 = vpack.c.bf16 %v91_v24, %v90_v23  ;;  %v92_v26 = vld [vmem:[#allocation8 + $0x70] sm:$0xff]  ;;  %v93_v27 = vld [vmem:[#allocation8 + $0x78] sm:$0xff]  ;;  %v74_v29 = vld [vmem:[#allocation6] sm:$0xff]  ;;  %v1615_v41 = vsel %vm1614_vm4, 1.0, %v2585_v1  ;;  %vm1617_vm5 = vcmp.gt.s32.totalorder %v2696_v12, 3 }
  0x3e   :  { %v2728_v28 = vpack.c.bf16 %v93_v27, %v92_v26  ;;  %v75_v30 = vld [vmem:[#allocation6 + $0x8] sm:$0xff]  ;;  %v76_v32 = vld [vmem:[#allocation6 + $0x10] sm:$0xff]  ;;  %v77_v33 = vld [vmem:[#allocation6 + $0x18] sm:$0xff]  ;;  %631 = vperm.xlu1 %2443, %v1615_v41   ;;  %v1618_v53 = vsel %vm1617_vm5, 1.0, %v2585_v1  ;;  %vm1620_vm6 = vcmp.gt.s32.totalorder %v2696_v12, 4  ;;  %vm1623_vm7 = vcmp.gt.s32.totalorder %v2696_v12, 5 }
  0x3f   :  { %2180 = vmatpush3.bf16.msra.mxu0 %v2685_v8  ;;  %2210 = vmatpush3.bf16.msra.mxu1 %v2685_v8  ;;  %v2734_v31 = vpack.c.bf16 %v75_v30, %v74_v29  ;;  %v2741_v34 = vpack.c.bf16 %v77_v33, %v76_v32  ;;  %v73_v35 = vld [vmem:[#allocation3] sm:$0xff]  ;;  %v263_v40 = vld [vmem:[#allocation3 + $0x8] sm:$0xff]  ;;  %v453_v52 = vld [vmem:[#allocation3 + $0x10] sm:$0xff]  ;;  %v1621_v2 = vsel %vm1620_vm6, 1.0, %v2585_v1  ;;  %v1624_v18 = vsel %vm1623_vm7, 1.0, %v2585_v1 }
  0x40   :  { %2181 = vmatprep.subr.bf16.mxu0 %v2583_v0  ;;  %2211 = vmatprep.subr.bf16.mxu1 %v2583_v0  ;;  %v638_v63 = vld [vmem:[#allocation3 + $0x18] sm:$0xff]  ;;  %v823_v17 = vld [vmem:[#allocation3 + $0x20] sm:$0xff]  ;;  %v1008_v33 = vld [vmem:[#allocation3 + $0x28] sm:$0xff]  ;;  %vm1626_vm8 = vcmp.gt.s32.totalorder %v2696_v12, 6  ;;  %vm1629_vm9 = vcmp.gt.s32.totalorder %v2696_v12, 7 }
  0x41   :  { %446 = vperm.xlu0 %2442, %v1612_v36  }
  0x42   :  { %816 = vperm.xlu1 %2443, %v1618_v53  }
  0x43   :  { %2183 = vmatpush3.bf16.msra.mxu0 %v2691_v11  ;;  %2213 = vmatpush3.bf16.msra.mxu1 %v2691_v11 }
  0x44   :  { %2184 = vmatprep.subr.bf16.mxu0 %v2583_v0  ;;  %2214 = vmatprep.subr.bf16.mxu1 %v2583_v0 }
  0x45   :  { %1001 = vperm.xlu0 %2442, %v1621_v2  }
  0x46   :  { %1186 = vperm.xlu1 %2443, %v1624_v18  }
  0x47   :  { %2186 = vmatpush3.bf16.msra.mxu0 %v2704_v16  ;;  %2216 = vmatpush3.bf16.msra.mxu1 %v2704_v16 }
  0x48   :  { %2187 = vmatprep.subr.bf16.mxu0 %v2583_v0  ;;  %2217 = vmatprep.subr.bf16.mxu1 %v2583_v0 }
  0x4b   :  { %2189 = vmatpush3.bf16.msra.mxu0 %v2710_v19  ;;  %2219 = vmatpush3.bf16.msra.mxu1 %v2710_v19 }
  0x4c   :  { %2190 = vmatprep.subr.bf16.mxu0 %v2583_v0  ;;  %2220 = vmatprep.subr.bf16.mxu1 %v2583_v0 }
  0x4f   :  { %2192 = vmatpush3.bf16.msra.mxu0 %v2716_v22  ;;  %2222 = vmatpush3.bf16.msra.mxu1 %v2716_v22 }
  0x50   :  { %2193 = vmatprep.subr.bf16.mxu0 %v2583_v0  ;;  %2223 = vmatprep.subr.bf16.mxu1 %v2583_v0 }
  0x53   :  { %2195 = vmatpush3.bf16.msra.mxu0 %v2722_v25  ;;  %2225 = vmatpush3.bf16.msra.mxu1 %v2722_v25 }
  0x54   :  { %2196 = vmatprep.subr.bf16.mxu0 %v2583_v0  ;;  %2226 = vmatprep.subr.bf16.mxu1 %v2583_v0 }
  0x57   :  { %2198 = vmatpush3.bf16.msra.mxu0 %v2728_v28  ;;  %2228 = vmatpush3.bf16.msra.mxu1 %v2728_v28 }
  0x58   :  { %2199 = vmatprep.subr.bf16.mxu0 %v2583_v0  ;;  %2229 = vmatprep.subr.bf16.mxu1 %v2583_v0 }
  0x5a   :  { %1840 = vmatmul.mubr.f32.vlgmr.msra.gmra.mrb[0].mxu0 %v2585_v1 }
  0x5b   :  { %2201 = vmatpush3.bf16.msra.mxu0 %v2734_v31  ;;  %1850 = vmatprep.mubr.msk.f32.mxu0 %vm2584_vm0, %v2585_v1 }
  0x5c   :  { %2202 = vmatprep.subr.bf16.mxu0 %v2583_v0 }
  0x5f   :  { %2204 = vmatpush3.bf16.msra.mxu0 %v2741_v34 }
  0x60   :  { %2235 = vmatprep.subr.bf16.mxu0 %v2583_v0 }
  0x62   :  { %1851 = vmatmul.mubr.msk.f32.vlgmr.msra.gmra.mrb[0].mxu0 %vm164_vm2, %v73_v35 }
  0x63   :  { %2237 = vmatpush3.bf16.msra.mxu0 %v2682_v6  ;;  %1931 = vmatprep.mubr.msk.f32.mxu0 %vm2584_vm0, %v2585_v1 }
  0x64   :  { %2238 = vmatprep.subr.bf16.mxu0 %v2583_v0 }
  0x67   :  { %2240 = vmatpush3.bf16.msra.mxu0 %v2685_v8 }
  0x68   :  { %2241 = vmatprep.subr.bf16.mxu0 %v2583_v0 }
  0x6b   :  { %2243 = vmatpush3.bf16.msra.mxu0 %v2691_v11 }
  0x6c   :  { %2244 = vmatprep.subr.bf16.mxu0 %v2583_v0 }
  0x6f   :  { %2246 = vmatpush3.bf16.msra.mxu0 %v2704_v16 }
  0x70   :  { %2247 = vmatprep.subr.bf16.mxu0 %v2583_v0 }
  0x73   :  { %2249 = vmatpush3.bf16.msra.mxu0 %v2710_v19 }
  0x74   :  { %2250 = vmatprep.subr.bf16.mxu0 %v2583_v0 }
  0x77   :  { %2252 = vmatpush3.bf16.msra.mxu0 %v2716_v22 }
  0x78   :  { %2253 = vmatprep.subr.bf16.mxu0 %v2583_v0 }
  0x7b   :  { %2255 = vmatpush3.bf16.msra.mxu0 %v2722_v25 }
  0x7c   :  { %2256 = vmatprep.subr.bf16.mxu0 %v2583_v0 }
  0x7f   :  { %2258 = vmatpush3.bf16.msra.mxu0 %v2728_v28 }
  0x80   :  { %2259 = vmatprep.subr.bf16.mxu0 %v2583_v0 }
  0xbc   :  { %v257_v44 = vpop.permute.xlu0 %256 }
  0xbd   :  { %v632_v59 = vpop.permute.xlu1 %631 }
  0xc0   :  { %v447_v48 = vpop.permute.xlu0 %446 }
  0xc1   :  { %v817_v10 = vpop.permute.xlu1 %816 }
  0xc4   :  { %v1002_v27 = vpop.permute.xlu0 %1001 }
  0xc5   :  { %v1187_v35 = vpop.permute.xlu1 %1186 }
 0x135   :  { %v234_v37 = vpop.f32.mrb[0].mxu0 }
 0x136   :  { %2444 = vtanh.f32 %v234_v37  ;;  %v1852_v38 = vpop.f32.mrb[1].mxu0  ;;  %v1193_v37 = vld [vmem:[#allocation3 + $0x30] sm:$0xff] }
 0x137   :  { %v1567_v38 = vld [vmem:[%s2949_s1] sm:$0xff]  ;;  %s2587_s1 = smov [#allocation9]  }
 0x138   :  { %s1580_s13 = sshll.u32 %s2587_s1, 4  ;;  %s1581_s13 = int_to_ptr.vmem [resolvable:$true] %s1580_s13 }
 0x139   :  { %s2526_s16 = scalar_lea.vmem %s1581_s13, 1024  ;;  %p2531_p11 = scmp.lt.s32.totalorder %s1581_s13, %s1581_s13 }
 0x13a   :  { %p2527_p10 = scmp.ne.s32.totalorder %s1581_s13, %s2526_s16  ;;  %p2532_p12 = scmp.lt.s32.totalorder %s2526_s16, %s2526_s16 }
 0x13c   :  { %p2533_p13 = por %p2532_p12, %p2531_p11 }
 0x13e   :  { %p2534_p0 = pnand %p2533_p13, %p2527_p10 }
 0x140   :  { %v2445_v39 = vpop.eup %2444 }
 0x141   :  { %248 = vst [vmem:[#allocation9] sm:$0xff] %v2445_v39  ;;  %1886 = vmatmul.mubr.f32.vlgmr.msra.gmra.mrb[0].mxu1 %v2445_v39  ;;  %v259_v45 = vmul.f32 %v2445_v39, %v257_v44  ;;  %v435_v46 = vmul.f32 0.0, %v2445_v39  ;;  %v1630_v39 = vsel %vm1629_vm9, 1.0, %v2585_v1 }
 0x142   :  { %2231 = vmatpush3.bf16.msra.mxu1 %v2734_v31  ;;  %1896 = vmatprep.mubr.msk.f32.mxu1 %vm2584_vm0, %v2585_v1 }
 0x143   :  { %2232 = vmatprep.subr.bf16.mxu1 %v2583_v0  ;;  %1556 = vperm.xlu1 %2443, %v1630_v39  }
 0x146   :  { %2234 = vmatpush3.bf16.msra.mxu1 %v2741_v34 }
 0x147   :  { %2265 = vmatprep.subr.bf16.mxu1 %v2583_v0 }
 0x149   :  { %1897 = vmatmul.mubr.msk.f32.vlgmr.msra.gmra.mrb[0].mxu1 %vm164_vm2, %v263_v40 }
 0x14a   :  { %2267 = vmatpush3.bf16.msra.mxu1 %v2682_v6  ;;  %1977 = vmatprep.mubr.msk.f32.mxu1 %vm2584_vm0, %v2585_v1 }
 0x14b   :  { %2268 = vmatprep.subr.bf16.mxu1 %v2583_v0 }
 0x14e   :  { %2270 = vmatpush3.bf16.msra.mxu1 %v2685_v8 }
 0x14f   :  { %2271 = vmatprep.subr.bf16.mxu1 %v2583_v0 }
 0x152   :  { %2273 = vmatpush3.bf16.msra.mxu1 %v2691_v11 }
 0x153   :  { %2274 = vmatprep.subr.bf16.mxu1 %v2583_v0 }
 0x156   :  { %2276 = vmatpush3.bf16.msra.mxu1 %v2704_v16 }
 0x157   :  { %2277 = vmatprep.subr.bf16.mxu1 %v2583_v0 }
 0x15a   :  { %2279 = vmatpush3.bf16.msra.mxu1 %v2710_v19 }
 0x15b   :  { %2280 = vmatprep.subr.bf16.mxu1 %v2583_v0 }
 0x15e   :  { %2282 = vmatpush3.bf16.msra.mxu1 %v2716_v22 }
 0x15f   :  { %2283 = vmatprep.subr.bf16.mxu1 %v2583_v0 }
 0x162   :  { %2285 = vmatpush3.bf16.msra.mxu1 %v2722_v25 }
 0x163   :  { %2286 = vmatprep.subr.bf16.mxu1 %v2583_v0 }
 0x166   :  { %2288 = vmatpush3.bf16.msra.mxu1 %v2728_v28 }
 0x167   :  { %2289 = vmatprep.subr.bf16.mxu1 %v2583_v0 }
 0x21c   :  { %v423_v42 = vpop.f32.mrb[0].mxu1 }
 0x21d   :  { %2446 = vtanh.f32 %v423_v42  ;;  %v1898_v43 = vpop.f32.mrb[1].mxu1 }
 0x227   :  { %v2447_v47 = vpop.eup %2446 }
 0x228   :  { %v436_v49 = vadd.f32 %v2447_v47, %v435_v46 }
 0x22a   :  { %438 = vst [vmem:[#allocation9 + $0x8] sm:$0xff] %v436_v49  ;;  %v449_v50 = vmul.f32 %v447_v48, %v436_v49  ;;  %1932 = vmatmul.mubr.f32.vlgmr.msra.gmra.mrb[2].mxu0 %v436_v49  ;;  %v619_v58 = vmul.f32 0.2, %v436_v49  ;;  %v1378_v48 = vld [vmem:[#allocation3 + $0x38] sm:$0xff] }
 0x22b   :  { %2261 = vmatpush3.bf16.msra.mxu0 %v2734_v31  ;;  %1942 = vmatprep.mubr.msk.f32.mxu0 %vm2584_vm0, %v2585_v1 }
 0x22c   :  { %v450_v51 = vadd.f32 %v449_v50, %v259_v45  ;;  %2262 = vmatprep.subr.bf16.mxu0 %v2583_v0 }
 0x22f   :  { %2264 = vmatpush3.bf16.msra.mxu0 %v2741_v34 }
 0x230   :  { %2295 = vmatprep.subr.bf16.mxu0 %v2583_v0 }
 0x232   :  { %1943 = vmatmul.mubr.msk.f32.vlgmr.msra.gmra.mrb[2].mxu0 %vm164_vm2, %v453_v52 }
 0x233   :  { %2297 = vmatpush3.bf16.msra.mxu0 %v2682_v6  ;;  %2023 = vmatprep.mubr.msk.f32.mxu0 %vm2584_vm0, %v2585_v1 }
 0x234   :  { %2298 = vmatprep.subr.bf16.mxu0 %v2583_v0 }
 0x237   :  { %2300 = vmatpush3.bf16.msra.mxu0 %v2685_v8 }
 0x238   :  { %2301 = vmatprep.subr.bf16.mxu0 %v2583_v0 }
 0x23b   :  { %2303 = vmatpush3.bf16.msra.mxu0 %v2691_v11 }
 0x23c   :  { %2304 = vmatprep.subr.bf16.mxu0 %v2583_v0 }
 0x23f   :  { %2306 = vmatpush3.bf16.msra.mxu0 %v2704_v16 }
 0x240   :  { %2307 = vmatprep.subr.bf16.mxu0 %v2583_v0 }
 0x243   :  { %2309 = vmatpush3.bf16.msra.mxu0 %v2710_v19 }
 0x244   :  { %2310 = vmatprep.subr.bf16.mxu0 %v2583_v0 }
 0x247   :  { %2312 = vmatpush3.bf16.msra.mxu0 %v2716_v22 }
 0x248   :  { %2313 = vmatprep.subr.bf16.mxu0 %v2583_v0 }
 0x24b   :  { %2315 = vmatpush3.bf16.msra.mxu0 %v2722_v25 }
 0x24c   :  { %2316 = vmatprep.subr.bf16.mxu0 %v2583_v0 }
 0x24f   :  { %2318 = vmatpush3.bf16.msra.mxu0 %v2728_v28 }
 0x250   :  { %2319 = vmatprep.subr.bf16.mxu0 %v2583_v0 }
 0x305   :  { %v613_v54 = vpop.f32.mrb[2].mxu0 }
 0x306   :  { %2448 = vtanh.f32 %v613_v54  ;;  %v1944_v55 = vpop.f32.mrb[3].mxu0  ;;  %v1557_v54 = vpop.permute.xlu1 %1556 }
 0x310   :  { %v2449_v56 = vpop.eup %2448 }
 0x311   :  { %v618_v57 = vmul.f32 0.8, %v2449_v56 }
 0x313   :  { %v620_v60 = vadd.f32 %v619_v58, %v618_v57 }
 0x315   :  { %622 = vst [vmem:[#allocation9 + $0x10] sm:$0xff] %v620_v60  ;;  %v634_v61 = vmul.f32 %v632_v59, %v620_v60  ;;  %1978 = vmatmul.mubr.f32.vlgmr.msra.gmra.mrb[2].mxu1 %v620_v60  ;;  %v804_v9 = vmul.f32 0.2, %v620_v60 }
 0x316   :  { %2291 = vmatpush3.bf16.msra.mxu1 %v2734_v31  ;;  %1988 = vmatprep.mubr.msk.f32.mxu1 %vm2584_vm0, %v2585_v1 }
 0x317   :  { %v635_v62 = vadd.f32 %v634_v61, %v450_v51  ;;  %2292 = vmatprep.subr.bf16.mxu1 %v2583_v0 }
 0x31a   :  { %2294 = vmatpush3.bf16.msra.mxu1 %v2741_v34 }
 0x31b   :  { %2325 = vmatprep.subr.bf16.mxu1 %v2583_v0 }
 0x31d   :  { %1989 = vmatmul.mubr.msk.f32.vlgmr.msra.gmra.mrb[2].mxu1 %vm164_vm2, %v638_v63 }
 0x31e   :  { %2327 = vmatpush3.bf16.msra.mxu1 %v2682_v6  ;;  %2069 = vmatprep.mubr.msk.f32.mxu1 %vm2584_vm0, %v2585_v1 }
 0x31f   :  { %2328 = vmatprep.subr.bf16.mxu1 %v2583_v0 }
 0x322   :  { %2330 = vmatpush3.bf16.msra.mxu1 %v2685_v8 }
 0x323   :  { %2331 = vmatprep.subr.bf16.mxu1 %v2583_v0 }
 0x326   :  { %2333 = vmatpush3.bf16.msra.mxu1 %v2691_v11 }
 0x327   :  { %2334 = vmatprep.subr.bf16.mxu1 %v2583_v0 }
 0x32a   :  { %2336 = vmatpush3.bf16.msra.mxu1 %v2704_v16 }
 0x32b   :  { %2337 = vmatprep.subr.bf16.mxu1 %v2583_v0 }
 0x32e   :  { %2339 = vmatpush3.bf16.msra.mxu1 %v2710_v19 }
 0x32f   :  { %2340 = vmatprep.subr.bf16.mxu1 %v2583_v0 }
 0x332   :  { %2342 = vmatpush3.bf16.msra.mxu1 %v2716_v22 }
 0x333   :  { %2343 = vmatprep.subr.bf16.mxu1 %v2583_v0 }
 0x336   :  { %2345 = vmatpush3.bf16.msra.mxu1 %v2722_v25 }
 0x337   :  { %2346 = vmatprep.subr.bf16.mxu1 %v2583_v0 }
 0x33a   :  { %2348 = vmatpush3.bf16.msra.mxu1 %v2728_v28 }
 0x33b   :  { %2349 = vmatprep.subr.bf16.mxu1 %v2583_v0 }
 0x3f0   :  { %v798_v3 = vpop.f32.mrb[2].mxu1 }
 0x3f1   :  { %2450 = vtanh.f32 %v798_v3  ;;  %v1990_v4 = vpop.f32.mrb[3].mxu1 }
 0x3fb   :  { %v2451_v5 = vpop.eup %2450 }
 0x3fc   :  { %v803_v7 = vmul.f32 0.8, %v2451_v5 }
 0x3fe   :  { %v805_v13 = vadd.f32 %v804_v9, %v803_v7 }
 0x400   :  { %807 = vst [vmem:[#allocation9 + $0x18] sm:$0xff] %v805_v13  ;;  %v819_v14 = vmul.f32 %v817_v10, %v805_v13  ;;  %2024 = vmatmul.mubr.f32.vlgmr.msra.gmra.mrb[4].mxu0 %v805_v13  ;;  %v989_v26 = vmul.f32 0.2, %v805_v13 }
 0x401   :  { %2321 = vmatpush3.bf16.msra.mxu0 %v2734_v31  ;;  %2034 = vmatprep.mubr.msk.f32.mxu0 %vm2584_vm0, %v2585_v1 }
 0x402   :  { %v820_v15 = vadd.f32 %v819_v14, %v635_v62  ;;  %2322 = vmatprep.subr.bf16.mxu0 %v2583_v0 }
 0x405   :  { %2324 = vmatpush3.bf16.msra.mxu0 %v2741_v34 }
 0x406   :  { %2355 = vmatprep.subr.bf16.mxu0 %v2583_v0 }
 0x408   :  { %2035 = vmatmul.mubr.msk.f32.vlgmr.msra.gmra.mrb[4].mxu0 %vm164_vm2, %v823_v17 }
 0x409   :  { %2357 = vmatpush3.bf16.msra.mxu0 %v2682_v6  ;;  %2115 = vmatprep.mubr.msk.f32.mxu0 %vm2584_vm0, %v2585_v1 }
 0x40a   :  { %2358 = vmatprep.subr.bf16.mxu0 %v2583_v0 }
 0x40d   :  { %2360 = vmatpush3.bf16.msra.mxu0 %v2685_v8 }
 0x40e   :  { %2361 = vmatprep.subr.bf16.mxu0 %v2583_v0 }
 0x411   :  { %2363 = vmatpush3.bf16.msra.mxu0 %v2691_v11 }
 0x412   :  { %2364 = vmatprep.subr.bf16.mxu0 %v2583_v0 }
 0x415   :  { %2366 = vmatpush3.bf16.msra.mxu0 %v2704_v16 }
 0x416   :  { %2367 = vmatprep.subr.bf16.mxu0 %v2583_v0 }
 0x419   :  { %2369 = vmatpush3.bf16.msra.mxu0 %v2710_v19 }
 0x41a   :  { %2370 = vmatprep.subr.bf16.mxu0 %v2583_v0 }
 0x41d   :  { %2372 = vmatpush3.bf16.msra.mxu0 %v2716_v22 }
 0x41e   :  { %2373 = vmatprep.subr.bf16.mxu0 %v2583_v0 }
 0x421   :  { %2375 = vmatpush3.bf16.msra.mxu0 %v2722_v25 }
 0x422   :  { %2376 = vmatprep.subr.bf16.mxu0 %v2583_v0 }
 0x425   :  { %2378 = vmatpush3.bf16.msra.mxu0 %v2728_v28 }
 0x426   :  { %2379 = vmatprep.subr.bf16.mxu0 %v2583_v0 }
 0x4db   :  { %v983_v20 = vpop.f32.mrb[4].mxu0 }
 0x4dc   :  { %2452 = vtanh.f32 %v983_v20  ;;  %v2036_v21 = vpop.f32.mrb[5].mxu0 }
 0x4e6   :  { %v2453_v23 = vpop.eup %2452 }
 0x4e7   :  { %v988_v24 = vmul.f32 0.8, %v2453_v23 }
 0x4e9   :  { %v990_v29 = vadd.f32 %v989_v26, %v988_v24 }
 0x4eb   :  { %992 = vst [vmem:[#allocation9 + $0x20] sm:$0xff] %v990_v29  ;;  %v1004_v30 = vmul.f32 %v1002_v27, %v990_v29  ;;  %2070 = vmatmul.mubr.f32.vlgmr.msra.gmra.mrb[4].mxu1 %v990_v29 }
 0x4ec   :  { %2351 = vmatpush3.bf16.msra.mxu1 %v2734_v31  ;;  %2080 = vmatprep.mubr.msk.f32.mxu1 %vm2584_vm0, %v2585_v1 }
 0x4ed   :  { %v1005_v32 = vadd.f32 %v1004_v30, %v820_v15  ;;  %2352 = vmatprep.subr.bf16.mxu1 %v2583_v0 }
 0x4f0   :  { %2354 = vmatpush3.bf16.msra.mxu1 %v2741_v34 }
 0x4f1   :  { %2385 = vmatprep.subr.bf16.mxu1 %v2583_v0 }
 0x4f3   :  { %2081 = vmatmul.mubr.msk.f32.vlgmr.msra.gmra.mrb[4].mxu1 %vm164_vm2, %v1008_v33 }
 0x4f4   :  { %2387 = vmatpush3.bf16.msra.mxu1 %v2682_v6  ;;  %2161 = vmatprep.mubr.msk.f32.mxu1 %vm2584_vm0, %v2585_v1  ;;  %v1627_v6 = vsel %vm1626_vm8, 1.0, %v2585_v1 }
 0x4f5   :  { %2388 = vmatprep.subr.bf16.mxu1 %v2583_v0  ;;  %1371 = vperm.xlu0 %2442, %v1627_v6  }
 0x4f8   :  { %2390 = vmatpush3.bf16.msra.mxu1 %v2685_v8 }
 0x4f9   :  { %2391 = vmatprep.subr.bf16.mxu1 %v2583_v0  ;;  %1570 = vperm.xlu0 %2442, %v1567_v38  }
 0x4fc   :  { %2393 = vmatpush3.bf16.msra.mxu1 %v2691_v11 }
 0x4fd   :  { %2394 = vmatprep.subr.bf16.mxu1 %v2583_v0 }
 0x500   :  { %2396 = vmatpush3.bf16.msra.mxu1 %v2704_v16 }
 0x501   :  { %2397 = vmatprep.subr.bf16.mxu1 %v2583_v0 }
 0x504   :  { %2399 = vmatpush3.bf16.msra.mxu1 %v2710_v19 }
 0x505   :  { %2400 = vmatprep.subr.bf16.mxu1 %v2583_v0 }
 0x508   :  { %2402 = vmatpush3.bf16.msra.mxu1 %v2716_v22  ;;  %v1174_v22 = vmul.f32 0.2, %v990_v29 }
 0x509   :  { %2403 = vmatprep.subr.bf16.mxu1 %v2583_v0 }
 0x50c   :  { %2405 = vmatpush3.bf16.msra.mxu1 %v2722_v25 }
 0x50d   :  { %2406 = vmatprep.subr.bf16.mxu1 %v2583_v0 }
 0x510   :  { %2408 = vmatpush3.bf16.msra.mxu1 %v2728_v28 }
 0x511   :  { %2409 = vmatprep.subr.bf16.mxu1 %v2583_v0 }
 0x574   :  { %v1372_v45 = vpop.permute.xlu0 %1371 }
 0x5c6   :  { %v1168_v8 = vpop.f32.mrb[4].mxu1 }
 0x5c7   :  { %2454 = vtanh.f32 %v1168_v8  ;;  %v2082_v11 = vpop.f32.mrb[5].mxu1 }
 0x5d1   :  { %v2455_v16 = vpop.eup %2454 }
 0x5d2   :  { %v1173_v19 = vmul.f32 0.8, %v2455_v16 }
 0x5d4   :  { %v1175_v36 = vadd.f32 %v1174_v22, %v1173_v19 }
 0x5d6   :  { %1177 = vst [vmem:[#allocation9 + $0x28] sm:$0xff] %v1175_v36  ;;  %v1189_v25 = vmul.f32 %v1187_v35, %v1175_v36  ;;  %2116 = vmatmul.mubr.f32.vlgmr.msra.gmra.mrb[6].mxu0 %v1175_v36  ;;  %v1359_v44 = vmul.f32 0.2, %v1175_v36 }
 0x5d7   :  { %2381 = vmatpush3.bf16.msra.mxu0 %v2734_v31  ;;  %2126 = vmatprep.mubr.msk.f32.mxu0 %vm2584_vm0, %v2585_v1 }
 0x5d8   :  { %v1190_v28 = vadd.f32 %v1189_v25, %v1005_v32  ;;  %2382 = vmatprep.subr.bf16.mxu0 %v2583_v0 }
 0x5db   :  { %2384 = vmatpush3.bf16.msra.mxu0 %v2741_v34 }
 0x5de   :  { %2127 = vmatmul.mubr.msk.f32.vlgmr.msra.gmra.mrb[6].mxu0 %vm164_vm2, %v1193_v37 }
 0x6b1   :  { %v1353_v40 = vpop.f32.mrb[6].mxu0 }
 0x6b2   :  { %2456 = vtanh.f32 %v1353_v40  ;;  %v2128_v41 = vpop.f32.mrb[7].mxu0 }
 0x6bc   :  { %v2457_v42 = vpop.eup %2456 }
 0x6bd   :  { %v1358_v43 = vmul.f32 0.8, %v2457_v42 }
 0x6bf   :  { %v1360_v46 = vadd.f32 %v1359_v44, %v1358_v43 }
 0x6c1   :  { %1362 = vst [vmem:[#allocation9 + $0x30] sm:$0xff] %v1360_v46  ;;  %v1374_v47 = vmul.f32 %v1372_v45, %v1360_v46  ;;  %2162 = vmatmul.mubr.f32.vlgmr.msra.gmra.mrb[6].mxu1 %v1360_v46  ;;  %v1544_v53 = vmul.f32 0.2, %v1360_v46 }
 0x6c2   :  { %2411 = vmatpush3.bf16.msra.mxu1 %v2734_v31  ;;  %2172 = vmatprep.mubr.msk.f32.mxu1 %vm2584_vm0, %v2585_v1 }
 0x6c3   :  { %v1375_v12 = vadd.f32 %v1374_v47, %v1190_v28  ;;  %2412 = vmatprep.subr.bf16.mxu1 %v2583_v0 }
 0x6c6   :  { %2414 = vmatpush3.bf16.msra.mxu1 %v2741_v34 }
 0x6c9   :  { %2173 = vmatmul.mubr.msk.f32.vlgmr.msra.gmra.mrb[6].mxu1 %vm164_vm2, %v1378_v48 }
 0x79c   :  { %v1538_v49 = vpop.f32.mrb[6].mxu1 }
 0x79d   :  { %2458 = vtanh.f32 %v1538_v49  ;;  %v2174_v50 = vpop.f32.mrb[7].mxu1 }
 0x7a7   :  { %v2459_v51 = vpop.eup %2458 }
 0x7a8   :  { %v1543_v52 = vmul.f32 0.8, %v2459_v51 }
 0x7aa   :  { %v1545_v31 = vadd.f32 %v1544_v53, %v1543_v52 }
 0x7ac   :  { %1547 = vst [vmem:[#allocation9 + $0x38] sm:$0xff] %v1545_v31  ;;  %v1559_v1 = vmul.f32 %v1557_v54, %v1545_v31 }
 0x7ad   :  { %2537 = shalt.err (!%p2534_p0)
}
 0x7ae   :  { %s2538_s19 = scalar_lea.hbm %s2953_s5, 1024 }
 0x7af   :  { %p2539_p1 = scmp.ne.s32.totalorder %s2953_s5, %s2538_s19  ;;  %p2542_p2 = scmp.lt.u32.totalorder %s2538_s19, %s2953_s5 }
 0x7b1   :  { %p2544_p3 = pnand %p2542_p2, %p2539_p1 }
 0x7b3   :  { %2547 = shalt.err (!%p2544_p3)
}
 0x7b4   :  { %1586 = dma.vmem_to_hbm [thread:$0]  %s1581_s13, 1024, %s2953_s5, [#allocation5], %s2580_s9, %s2580_s9, %s2581_s10   ;;  %v1560_v0 = vadd.f32 %v1559_v1, %v1375_v12  ;;  %v1571_v34 = vpop.permute.xlu0 %1570 }
 0x7b5   :  { %s2548_s26 = scalar_lea.vmem %s1594_s15, 128  ;;  %p2553_p5 = scmp.lt.s32.totalorder %s1594_s15, %s1594_s15 }
 0x7b6   :  { %v1573_v55 = vmul.f32 %v1571_v34, %v1560_v0  ;;  %p2549_p4 = scmp.ne.s32.totalorder %s1594_s15, %s2548_s26  ;;  %p2554_p6 = scmp.lt.s32.totalorder %s2548_s26, %s2548_s26 }
 0x7b8   :  { %1574 = vst [vmem:[#allocation10] sm:$0xff] %v1573_v55  ;;  %p2555_p7 = por %p2554_p6, %p2553_p5 }
 0x7ba   :  { %p2556_p8 = pnand %p2555_p7, %p2549_p4 }
 0x7bc   :  { %2559 = shalt.err (!%p2556_p8)
}
 0x7bd   :  { %s2560_s29 = scalar_lea.hbm %s2954_s6, 128 }
 0x7be   :  { %p2561_p9 = scmp.ne.s32.totalorder %s2954_s6, %s2560_s29  ;;  %p2564_p10 = scmp.lt.u32.totalorder %s2560_s29, %s2954_s6 }
 0x7c0   :  { %p2566_p11 = pnand %p2564_p10, %p2561_p9 }
 0x7c2   :  { %2569 = shalt.err (!%p2566_p11)
}
 0x7c3   :  { %1596 = dma.vmem_to_hbm [thread:$0]  %s1594_s15, 128, %s2954_s6, [#allocation11]  }
 0x7c4   :  { %2574 = dma.done.wait [#allocation5], 1024  }
 0x7c5   :  { %2575 = vsyncadd [#allocation5], 4294966272 }
 0x7c6   :  { %2576 = dma.done.wait [#allocation11], 128  }
 0x7c7   :  { %2577 = vsyncadd [#allocation11], 4294967168 }
 0x7c8   :  { %1603 = vsyncpa [#allocation4], 1 }
 0x7c9   :  { %1604 = vsyncpa [#allocation7], 1 }
 0x7ca   :  { %1605 = vsyncpa [#allocation5], 1 }
 0x7cb   :  { %1606 = vsyncpa [#allocation11], 1 }

// kernel: tpu_custom_call.1
= control target key start
LH: loop header
LB: loop body
LE: loop exit
PB: predicated region body
PF: predicated region fallthrough
CT: control target
= control target key end

     0   :  { %12 = vsyncpa [#allocation4], 0  ;;  %s2948_s0 = inlined_call_operand.vmem [shape: s32[8,1], index: 0, kind: input, shape index: {}]   ;;  %s2949_s1 = inlined_call_operand.vmem [shape: f32[8,1], index: 1, kind: input, shape index: {}]   ;;  %s2950_s2 = inlined_call_operand.hbm [shape: f32[8,8,32], index: 2, kind: input, shape index: {}]   ;;  %s2951_s3 = inlined_call_operand.hbm [shape: f32[32,128], index: 3, kind: input, shape index: {}]   ;;  %s2952_s4 = inlined_call_operand.hbm [shape: f32[128,128], index: 4, kind: input, shape index: {}]   ;;  %s2953_s5 = inlined_call_operand.hbm [shape: f32[8,8,128], index: 5, kind: output, shape index: {0}]   ;;  %s2954_s6 = inlined_call_operand.hbm [shape: f32[8,128], index: 6, kind: output, shape index: {1}]  }
   0x1   :  { %13 = vsyncpa [#allocation7], 0 }
   0x2   :  { %14 = vsyncpa [#allocation5], 0 }
   0x3   :  { %15 = vsyncpa [#allocation11], 0  ;;  %s2578_s21 = smov [#allocation6]   ;;  %s2579_s23 = smov [#allocation3]  }
   0x4   :  { %s37_s22 = sshll.u32 %s2578_s21, 4  ;;  %s25_s24 = sshll.u32 %s2579_s23, 4  ;;  %s38_s22 = int_to_ptr.vmem [resolvable:$true] %s37_s22  ;;  %s2624_s24 = int_to_ptr.vmem [resolvable:$true] %s25_s24 }
   0x5   :  { %s2460_s27 = scalar_lea.hbm %s2951_s3, 512 }
   0x6   :  { %p2461_p0 = scmp.ne.s32.totalorder %s2951_s3, %s2460_s27  ;;  %p2464_p1 = scmp.lt.u32.totalorder %s2460_s27, %s2951_s3 }
   0x8   :  { %p2466_p2 = pnand %p2464_p1, %p2461_p0 }
   0xa   :  { %2469 = shalt.err (!%p2466_p2)
}
   0xb   :  { %s2470_s8 = scalar_lea.vmem %s38_s22, 512  ;;  %p2475_p4 = scmp.lt.s32.totalorder %s38_s22, %s38_s22 }
   0xc   :  { %p2471_p3 = scmp.ne.s32.totalorder %s38_s22, %s2470_s8  ;;  %p2476_p5 = scmp.lt.s32.totalorder %s2470_s8, %s2470_s8 }
   0xe   :  { %p2477_p6 = por %p2476_p5, %p2475_p4 }
  0x10   :  { %p2478_p7 = pnand %p2477_p6, %p2471_p3 }
  0x12   :  { %2481 = shalt.err (!%p2478_p7)
}
  0x13   :  { %s2580_s9 = smov 128   ;;  %s2581_s10 = smov 8  }
  0x14   :  { %43 = dma.hbm_to_vmem [thread:$0]  %s2951_s3, 512, %s38_s22, [#allocation7], %s2580_s9, %s2580_s9, %s2581_s10  }
  0x15   :  { %s2482_s15 = scalar_lea.hbm %s2950_s2, 1024 }
  0x16   :  { %p2483_p8 = scmp.ne.s32.totalorder %s2950_s2, %s2482_s15  ;;  %p2486_p9 = scmp.lt.u32.totalorder %s2482_s15, %s2950_s2 }
  0x18   :  { %p2488_p10 = pnand %p2486_p9, %p2483_p8 }
  0x1a   :  { %2491 = shalt.err (!%p2488_p10)
}
  0x1b   :  { %s2492_s20 = scalar_lea.vmem %s2624_s24, 1024  ;;  %p2497_p12 = scmp.lt.s32.totalorder %s2624_s24, %s2624_s24 }
  0x1c   :  { %p2493_p11 = scmp.ne.s32.totalorder %s2624_s24, %s2492_s20  ;;  %p2498_p13 = scmp.lt.s32.totalorder %s2492_s20, %s2492_s20 }
  0x1e   :  { %p2499_p0 = por %p2498_p13, %p2497_p12 }
  0x20   :  { %p2500_p1 = pnand %p2499_p0, %p2493_p11 }
  0x22   :  { %2503 = shalt.err (!%p2500_p1)
}
  0x23   :  { %31 = dma.hbm_to_vmem [thread:$0]  %s2950_s2, 1024, %s2624_s24, [#allocation4], %s2580_s9, %s2580_s9, %s2581_s10  }
  0x24   :  { %s2582_s22 = smov [#allocation8]   ;;  %s2504_s27 = scalar_lea.hbm %s2952_s4, 2048 }
  0x25   :  { %s49_s23 = sshll.u32 %s2582_s22, 4  ;;  %p2505_p2 = scmp.ne.s32.totalorder %s2952_s4, %s2504_s27  ;;  %s50_s23 = int_to_ptr.vmem [resolvable:$true] %s49_s23 }
  0x26   :  { %p2508_p3 = scmp.lt.u32.totalorder %s2504_s27, %s2952_s4 }
  0x28   :  { %p2510_p4 = pnand %p2508_p3, %p2505_p2 }
  0x2a   :  { %2513 = shalt.err (!%p2510_p4)
}
  0x2b   :  { %s2514_s8 = scalar_lea.vmem %s50_s23, 2048  ;;  %p2519_p6 = scmp.lt.s32.totalorder %s50_s23, %s50_s23 }
  0x2c   :  { %p2515_p5 = scmp.ne.s32.totalorder %s50_s23, %s2514_s8  ;;  %p2520_p7 = scmp.lt.s32.totalorder %s2514_s8, %s2514_s8 }
  0x2e   :  { %p2521_p8 = por %p2520_p7, %p2519_p6 }
  0x30   :  { %p2522_p9 = pnand %p2521_p8, %p2515_p5 }
  0x32   :  { %2525 = shalt.err (!%p2522_p9)
}
  0x33   :  { %55 = dma.hbm_to_vmem [thread:$0]  %s2952_s4, 2048, %s50_s23, [#allocation7], %s2580_s9, %s2580_s9, %s2581_s10  }
  0x34   :  { %2570 = dma.done.wait [#allocation4], 1024  }
  0x35   :  { %2571 = vsyncadd [#allocation4], 4294966272 }
  0x36   :  { %2572 = dma.done.wait [#allocation7], 2560  }
  0x37   :  { %2573 = vsyncadd [#allocation7], 4294964736  ;;  %v2583_v0 = vmov 0.0|0.0   ;;  %vm2584_vm0 = vmmov 0   ;;  %v2585_v1 = vmov 0.0   ;;  %v2586_v2 = vmov 0  }
  0x38   :  { %2175 = vmatprep.subr.bf16.mxu0 %v2583_v0  ;;  %1839 = vmatprep.mubr.msk.f32.mxu0 %vm2584_vm0, %v2585_v1  ;;  %v78_v3 = vld [vmem:[#allocation8] sm:$0xff]  ;;  %v79_v4 = vld [vmem:[#allocation8 + $0x8] sm:$0xff]  ;;  %v80_v5 = vld [vmem:[#allocation8 + $0x10] sm:$0xff]  ;;  %vm164_vm2 = vcmask 261120   ;;  %s2588_s14 = smov [#allocation10]  }
  0x39   :  { %2442 = vset.pattern.permute.xlu0 %v2586_v2  ;;  %2205 = vmatprep.subr.bf16.mxu1 %v2583_v0  ;;  %v2682_v6 = vpack.c.bf16 %v79_v4, %v78_v3  ;;  %v81_v7 = vld [vmem:[#allocation8 + $0x18] sm:$0xff]  ;;  %v82_v9 = vld [vmem:[#allocation8 + $0x20] sm:$0xff]  ;;  %v83_v10 = vld [vmem:[#allocation8 + $0x28] sm:$0xff]  ;;  %s1593_s15 = sshll.u32 %s2588_s14, 4  ;;  %s1594_s15 = int_to_ptr.vmem [resolvable:$true] %s1593_s15 }
  0x3a   :  { %1885 = vmatprep.mubr.msk.f32.mxu1 %vm2584_vm0, %v2585_v1  ;;  %2443 = vset.pattern.permute.xlu1 %v2586_v2  ;;  %v2685_v8 = vpack.c.bf16 %v81_v7, %v80_v5  ;;  %v2691_v11 = vpack.c.bf16 %v83_v10, %v82_v9  ;;  %v2696_v12 = vld [vmem:[%s2948_s0] sm:$0xff]  ;;  %v84_v13 = vld [vmem:[#allocation8 + $0x30] sm:$0xff]  ;;  %v86_v17 = vld [vmem:[#allocation8 + $0x40] sm:$0xff] }
  0x3b   :  { %2177 = vmatpush3.bf16.msra.mxu0 %v2682_v6  ;;  %2207 = vmatpush3.bf16.msra.mxu1 %v2682_v6  ;;  %v85_v14 = vld [vmem:[#allocation8 + $0x38] sm:$0xff]  ;;  %vm1608_vm1 = vcmp.gt.s32.totalorder %v2696_v12, 0  ;;  %v87_v18 = vld [vmem:[#allocation8 + $0x48] sm:$0xff]  ;;  %v88_v20 = vld [vmem:[#allocation8 + $0x50] sm:$0xff]  ;;  %vm1611_vm3 = vcmp.gt.s32.totalorder %v2696_v12, 1  ;;  %vm1614_vm4 = vcmp.gt.s32.totalorder %v2696_v12, 2 }
  0x3c   :  { %2178 = vmatprep.subr.bf16.mxu0 %v2583_v0  ;;  %2208 = vmatprep.subr.bf16.mxu1 %v2583_v0  ;;  %v1609_v15 = vsel %vm1608_vm1, 1.0, %v2585_v1  ;;  %v2704_v16 = vpack.c.bf16 %v85_v14, %v84_v13  ;;  %v2710_v19 = vpack.c.bf16 %v87_v18, %v86_v17  ;;  %v89_v21 = vld [vmem:[#allocation8 + $0x58] sm:$0xff]  ;;  %v90_v23 = vld [vmem:[#allocation8 + $0x60] sm:$0xff]  ;;  %v91_v24 = vld [vmem:[#allocation8 + $0x68] sm:$0xff]  ;;  %v1612_v36 = vsel %vm1611_vm3, 1.0, %v2585_v1 }
  0x3d   :  { %256 = vperm.xlu0 %2442, %v1609_v15   ;;  %v2716_v22 = vpack.c.bf16 %v89_v21, %v88_v20  ;;  %v2722_v25 = vpack.c.bf16 %v91_v24, %v90_v23  ;;  %v92_v26 = vld [vmem:[#allocation8 + $0x70] sm:$0xff]  ;;  %v93_v27 = vld [vmem:[#allocation8 + $0x78] sm:$0xff]  ;;  %v74_v29 = vld [vmem:[#allocation6] sm:$0xff]  ;;  %v1615_v41 = vsel %vm1614_vm4, 1.0, %v2585_v1  ;;  %vm1617_vm5 = vcmp.gt.s32.totalorder %v2696_v12, 3 }
  0x3e   :  { %v2728_v28 = vpack.c.bf16 %v93_v27, %v92_v26  ;;  %v75_v30 = vld [vmem:[#allocation6 + $0x8] sm:$0xff]  ;;  %v76_v32 = vld [vmem:[#allocation6 + $0x10] sm:$0xff]  ;;  %v77_v33 = vld [vmem:[#allocation6 + $0x18] sm:$0xff]  ;;  %631 = vperm.xlu1 %2443, %v1615_v41   ;;  %v1618_v53 = vsel %vm1617_vm5, 1.0, %v2585_v1  ;;  %vm1620_vm6 = vcmp.gt.s32.totalorder %v2696_v12, 4  ;;  %vm1623_vm7 = vcmp.gt.s32.totalorder %v2696_v12, 5 }
  0x3f   :  { %2180 = vmatpush3.bf16.msra.mxu0 %v2685_v8  ;;  %2210 = vmatpush3.bf16.msra.mxu1 %v2685_v8  ;;  %v2734_v31 = vpack.c.bf16 %v75_v30, %v74_v29  ;;  %v2741_v34 = vpack.c.bf16 %v77_v33, %v76_v32  ;;  %v73_v35 = vld [vmem:[#allocation3] sm:$0xff]  ;;  %v263_v40 = vld [vmem:[#allocation3 + $0x8] sm:$0xff]  ;;  %v453_v52 = vld [vmem:[#allocation3 + $0x10] sm:$0xff]  ;;  %v1621_v2 = vsel %vm1620_vm6, 1.0, %v2585_v1  ;;  %v1624_v18 = vsel %vm1623_vm7, 1.0, %v2585_v1 }
  0x40   :  { %2181 = vmatprep.subr.bf16.mxu0 %v2583_v0  ;;  %2211 = vmatprep.subr.bf16.mxu1 %v2583_v0  ;;  %v638_v63 = vld [vmem:[#allocation3 + $0x18] sm:$0xff]  ;;  %v823_v17 = vld [vmem:[#allocation3 + $0x20] sm:$0xff]  ;;  %v1008_v33 = vld [vmem:[#allocation3 + $0x28] sm:$0xff]  ;;  %vm1626_vm8 = vcmp.gt.s32.totalorder %v2696_v12, 6  ;;  %vm1629_vm9 = vcmp.gt.s32.totalorder %v2696_v12, 7 }
  0x41   :  { %446 = vperm.xlu0 %2442, %v1612_v36  }
  0x42   :  { %816 = vperm.xlu1 %2443, %v1618_v53  }
  0x43   :  { %2183 = vmatpush3.bf16.msra.mxu0 %v2691_v11  ;;  %2213 = vmatpush3.bf16.msra.mxu1 %v2691_v11 }
  0x44   :  { %2184 = vmatprep.subr.bf16.mxu0 %v2583_v0  ;;  %2214 = vmatprep.subr.bf16.mxu1 %v2583_v0 }
  0x45   :  { %1001 = vperm.xlu0 %2442, %v1621_v2  }
  0x46   :  { %1186 = vperm.xlu1 %2443, %v1624_v18  }
  0x47   :  { %2186 = vmatpush3.bf16.msra.mxu0 %v2704_v16  ;;  %2216 = vmatpush3.bf16.msra.mxu1 %v2704_v16 }
  0x48   :  { %2187 = vmatprep.subr.bf16.mxu0 %v2583_v0  ;;  %2217 = vmatprep.subr.bf16.mxu1 %v2583_v0 }
  0x4b   :  { %2189 = vmatpush3.bf16.msra.mxu0 %v2710_v19  ;;  %2219 = vmatpush3.bf16.msra.mxu1 %v2710_v19 }
  0x4c   :  { %2190 = vmatprep.subr.bf16.mxu0 %v2583_v0  ;;  %2220 = vmatprep.subr.bf16.mxu1 %v2583_v0 }
  0x4f   :  { %2192 = vmatpush3.bf16.msra.mxu0 %v2716_v22  ;;  %2222 = vmatpush3.bf16.msra.mxu1 %v2716_v22 }
  0x50   :  { %2193 = vmatprep.subr.bf16.mxu0 %v2583_v0  ;;  %2223 = vmatprep.subr.bf16.mxu1 %v2583_v0 }
  0x53   :  { %2195 = vmatpush3.bf16.msra.mxu0 %v2722_v25  ;;  %2225 = vmatpush3.bf16.msra.mxu1 %v2722_v25 }
  0x54   :  { %2196 = vmatprep.subr.bf16.mxu0 %v2583_v0  ;;  %2226 = vmatprep.subr.bf16.mxu1 %v2583_v0 }
  0x57   :  { %2198 = vmatpush3.bf16.msra.mxu0 %v2728_v28  ;;  %2228 = vmatpush3.bf16.msra.mxu1 %v2728_v28 }
  0x58   :  { %2199 = vmatprep.subr.bf16.mxu0 %v2583_v0  ;;  %2229 = vmatprep.subr.bf16.mxu1 %v2583_v0 }
  0x5a   :  { %1840 = vmatmul.mubr.f32.vlgmr.msra.gmra.mrb[0].mxu0 %v2585_v1 }
  0x5b   :  { %2201 = vmatpush3.bf16.msra.mxu0 %v2734_v31  ;;  %1850 = vmatprep.mubr.msk.f32.mxu0 %vm2584_vm0, %v2585_v1 }
  0x5c   :  { %2202 = vmatprep.subr.bf16.mxu0 %v2583_v0 }
  0x5f   :  { %2204 = vmatpush3.bf16.msra.mxu0 %v2741_v34 }
  0x60   :  { %2235 = vmatprep.subr.bf16.mxu0 %v2583_v0 }
  0x62   :  { %1851 = vmatmul.mubr.msk.f32.vlgmr.msra.gmra.mrb[0].mxu0 %vm164_vm2, %v73_v35 }
  0x63   :  { %2237 = vmatpush3.bf16.msra.mxu0 %v2682_v6  ;;  %1931 = vmatprep.mubr.msk.f32.mxu0 %vm2584_vm0, %v2585_v1 }
  0x64   :  { %2238 = vmatprep.subr.bf16.mxu0 %v2583_v0 }
  0x67   :  { %2240 = vmatpush3.bf16.msra.mxu0 %v2685_v8 }
  0x68   :  { %2241 = vmatprep.subr.bf16.mxu0 %v2583_v0 }
  0x6b   :  { %2243 = vmatpush3.bf16.msra.mxu0 %v2691_v11 }
  0x6c   :  { %2244 = vmatprep.subr.bf16.mxu0 %v2583_v0 }
  0x6f   :  { %2246 = vmatpush3.bf16.msra.mxu0 %v2704_v16 }
  0x70   :  { %2247 = vmatprep.subr.bf16.mxu0 %v2583_v0 }
  0x73   :  { %2249 = vmatpush3.bf16.msra.mxu0 %v2710_v19 }
  0x74   :  { %2250 = vmatprep.subr.bf16.mxu0 %v2583_v0 }
  0x77   :  { %2252 = vmatpush3.bf16.msra.mxu0 %v2716_v22 }
  0x78   :  { %2253 = vmatprep.subr.bf16.mxu0 %v2583_v0 }
  0x7b   :  { %2255 = vmatpush3.bf16.msra.mxu0 %v2722_v25 }
  0x7c   :  { %2256 = vmatprep.subr.bf16.mxu0 %v2583_v0 }
  0x7f   :  { %2258 = vmatpush3.bf16.msra.mxu0 %v2728_v28 }
  0x80   :  { %2259 = vmatprep.subr.bf16.mxu0 %v2583_v0 }
  0xbc   :  { %v257_v44 = vpop.permute.xlu0 %256 }
  0xbd   :  { %v632_v59 = vpop.permute.xlu1 %631 }
  0xc0   :  { %v447_v48 = vpop.permute.xlu0 %446 }
  0xc1   :  { %v817_v10 = vpop.permute.xlu1 %816 }
  0xc4   :  { %v1002_v27 = vpop.permute.xlu0 %1001 }
  0xc5   :  { %v1187_v35 = vpop.permute.xlu1 %1186 }
 0x135   :  { %v234_v37 = vpop.f32.mrb[0].mxu0 }
 0x136   :  { %2444 = vtanh.f32 %v234_v37  ;;  %v1852_v38 = vpop.f32.mrb[1].mxu0  ;;  %v1193_v37 = vld [vmem:[#allocation3 + $0x30] sm:$0xff] }
 0x137   :  { %v1567_v38 = vld [vmem:[%s2949_s1] sm:$0xff]  ;;  %s2587_s1 = smov [#allocation9]  }
 0x138   :  { %s1580_s13 = sshll.u32 %s2587_s1, 4  ;;  %s1581_s13 = int_to_ptr.vmem [resolvable:$true] %s1580_s13 }
 0x139   :  { %s2526_s16 = scalar_lea.vmem %s1581_s13, 1024  ;;  %p2531_p11 = scmp.lt.s32.totalorder %s1581_s13, %s1581_s13 }
 0x13a   :  { %p2527_p10 = scmp.ne.s32.totalorder %s1581_s13, %s2526_s16  ;;  %p2532_p12 = scmp.lt.s32.totalorder %s2526_s16, %s2526_s16 }
 0x13c   :  { %p2533_p13 = por %p2532_p12, %p2531_p11 }
 0x13e   :  { %p2534_p0 = pnand %p2533_p13, %p2527_p10 }
 0x140   :  { %v2445_v39 = vpop.eup %2444 }
 0x141   :  { %248 = vst [vmem:[#allocation9] sm:$0xff] %v2445_v39  ;;  %1886 = vmatmul.mubr.f32.vlgmr.msra.gmra.mrb[0].mxu1 %v2445_v39  ;;  %v259_v45 = vmul.f32 %v2445_v39, %v257_v44  ;;  %v435_v46 = vmul.f32 0.0, %v2445_v39  ;;  %v1630_v39 = vsel %vm1629_vm9, 1.0, %v2585_v1 }
 0x142   :  { %2231 = vmatpush3.bf16.msra.mxu1 %v2734_v31  ;;  %1896 = vmatprep.mubr.msk.f32.mxu1 %vm2584_vm0, %v2585_v1 }
 0x143   :  { %2232 = vmatprep.subr.bf16.mxu1 %v2583_v0  ;;  %1556 = vperm.xlu1 %2443, %v1630_v39  }
 0x146   :  { %2234 = vmatpush3.bf16.msra.mxu1 %v2741_v34 }
 0x147   :  { %2265 = vmatprep.subr.bf16.mxu1 %v2583_v0 }
 0x149   :  { %1897 = vmatmul.mubr.msk.f32.vlgmr.msra.gmra.mrb[0].mxu1 %vm164_vm2, %v263_v40 }
 0x14a   :  { %2267 = vmatpush3.bf16.msra.mxu1 %v2682_v6  ;;  %1977 = vmatprep.mubr.msk.f32.mxu1 %vm2584_vm0, %v2585_v1 }
 0x14b   :  { %2268 = vmatprep.subr.bf16.mxu1 %v2583_v0 }
 0x14e   :  { %2270 = vmatpush3.bf16.msra.mxu1 %v2685_v8 }
 0x14f   :  { %2271 = vmatprep.subr.bf16.mxu1 %v2583_v0 }
 0x152   :  { %2273 = vmatpush3.bf16.msra.mxu1 %v2691_v11 }
 0x153   :  { %2274 = vmatprep.subr.bf16.mxu1 %v2583_v0 }
 0x156   :  { %2276 = vmatpush3.bf16.msra.mxu1 %v2704_v16 }
 0x157   :  { %2277 = vmatprep.subr.bf16.mxu1 %v2583_v0 }
 0x15a   :  { %2279 = vmatpush3.bf16.msra.mxu1 %v2710_v19 }
 0x15b   :  { %2280 = vmatprep.subr.bf16.mxu1 %v2583_v0 }
 0x15e   :  { %2282 = vmatpush3.bf16.msra.mxu1 %v2716_v22 }
 0x15f   :  { %2283 = vmatprep.subr.bf16.mxu1 %v2583_v0 }
 0x162   :  { %2285 = vmatpush3.bf16.msra.mxu1 %v2722_v25 }
 0x163   :  { %2286 = vmatprep.subr.bf16.mxu1 %v2583_v0 }
 0x166   :  { %2288 = vmatpush3.bf16.msra.mxu1 %v2728_v28 }
 0x167   :  { %2289 = vmatprep.subr.bf16.mxu1 %v2583_v0 }
 0x21c   :  { %v423_v42 = vpop.f32.mrb[0].mxu1 }
 0x21d   :  { %2446 = vtanh.f32 %v423_v42  ;;  %v1898_v43 = vpop.f32.mrb[1].mxu1 }
 0x227   :  { %v2447_v47 = vpop.eup %2446 }
 0x228   :  { %v436_v49 = vadd.f32 %v2447_v47, %v435_v46 }
 0x22a   :  { %438 = vst [vmem:[#allocation9 + $0x8] sm:$0xff] %v436_v49  ;;  %v449_v50 = vmul.f32 %v447_v48, %v436_v49  ;;  %1932 = vmatmul.mubr.f32.vlgmr.msra.gmra.mrb[2].mxu0 %v436_v49  ;;  %v619_v58 = vmul.f32 0.2, %v436_v49  ;;  %v1378_v48 = vld [vmem:[#allocation3 + $0x38] sm:$0xff] }
 0x22b   :  { %2261 = vmatpush3.bf16.msra.mxu0 %v2734_v31  ;;  %1942 = vmatprep.mubr.msk.f32.mxu0 %vm2584_vm0, %v2585_v1 }
 0x22c   :  { %v450_v51 = vadd.f32 %v449_v50, %v259_v45  ;;  %2262 = vmatprep.subr.bf16.mxu0 %v2583_v0 }
 0x22f   :  { %2264 = vmatpush3.bf16.msra.mxu0 %v2741_v34 }
 0x230   :  { %2295 = vmatprep.subr.bf16.mxu0 %v2583_v0 }
 0x232   :  { %1943 = vmatmul.mubr.msk.f32.vlgmr.msra.gmra.mrb[2].mxu0 %vm164_vm2, %v453_v52 }
 0x233   :  { %2297 = vmatpush3.bf16.msra.mxu0 %v2682_v6  ;;  %2023 = vmatprep.mubr.msk.f32.mxu0 %vm2584_vm0, %v2585_v1 }
 0x234   :  { %2298 = vmatprep.subr.bf16.mxu0 %v2583_v0 }
 0x237   :  { %2300 = vmatpush3.bf16.msra.mxu0 %v2685_v8 }
 0x238   :  { %2301 = vmatprep.subr.bf16.mxu0 %v2583_v0 }
 0x23b   :  { %2303 = vmatpush3.bf16.msra.mxu0 %v2691_v11 }
 0x23c   :  { %2304 = vmatprep.subr.bf16.mxu0 %v2583_v0 }
 0x23f   :  { %2306 = vmatpush3.bf16.msra.mxu0 %v2704_v16 }
 0x240   :  { %2307 = vmatprep.subr.bf16.mxu0 %v2583_v0 }
 0x243   :  { %2309 = vmatpush3.bf16.msra.mxu0 %v2710_v19 }
 0x244   :  { %2310 = vmatprep.subr.bf16.mxu0 %v2583_v0 }
 0x247   :  { %2312 = vmatpush3.bf16.msra.mxu0 %v2716_v22 }
 0x248   :  { %2313 = vmatprep.subr.bf16.mxu0 %v2583_v0 }
 0x24b   :  { %2315 = vmatpush3.bf16.msra.mxu0 %v2722_v25 }
 0x24c   :  { %2316 = vmatprep.subr.bf16.mxu0 %v2583_v0 }
 0x24f   :  { %2318 = vmatpush3.bf16.msra.mxu0 %v2728_v28 }
 0x250   :  { %2319 = vmatprep.subr.bf16.mxu0 %v2583_v0 }
 0x305   :  { %v613_v54 = vpop.f32.mrb[2].mxu0 }
 0x306   :  { %2448 = vtanh.f32 %v613_v54  ;;  %v1944_v55 = vpop.f32.mrb[3].mxu0  ;;  %v1557_v54 = vpop.permute.xlu1 %1556 }
 0x310   :  { %v2449_v56 = vpop.eup %2448 }
 0x311   :  { %v618_v57 = vmul.f32 0.8, %v2449_v56 }
 0x313   :  { %v620_v60 = vadd.f32 %v619_v58, %v618_v57 }
 0x315   :  { %622 = vst [vmem:[#allocation9 + $0x10] sm:$0xff] %v620_v60  ;;  %v634_v61 = vmul.f32 %v632_v59, %v620_v60  ;;  %1978 = vmatmul.mubr.f32.vlgmr.msra.gmra.mrb[2].mxu1 %v620_v60  ;;  %v804_v9 = vmul.f32 0.2, %v620_v60 }
 0x316   :  { %2291 = vmatpush3.bf16.msra.mxu1 %v2734_v31  ;;  %1988 = vmatprep.mubr.msk.f32.mxu1 %vm2584_vm0, %v2585_v1 }
 0x317   :  { %v635_v62 = vadd.f32 %v634_v61, %v450_v51  ;;  %2292 = vmatprep.subr.bf16.mxu1 %v2583_v0 }
 0x31a   :  { %2294 = vmatpush3.bf16.msra.mxu1 %v2741_v34 }
 0x31b   :  { %2325 = vmatprep.subr.bf16.mxu1 %v2583_v0 }
 0x31d   :  { %1989 = vmatmul.mubr.msk.f32.vlgmr.msra.gmra.mrb[2].mxu1 %vm164_vm2, %v638_v63 }
 0x31e   :  { %2327 = vmatpush3.bf16.msra.mxu1 %v2682_v6  ;;  %2069 = vmatprep.mubr.msk.f32.mxu1 %vm2584_vm0, %v2585_v1 }
 0x31f   :  { %2328 = vmatprep.subr.bf16.mxu1 %v2583_v0 }
 0x322   :  { %2330 = vmatpush3.bf16.msra.mxu1 %v2685_v8 }
 0x323   :  { %2331 = vmatprep.subr.bf16.mxu1 %v2583_v0 }
 0x326   :  { %2333 = vmatpush3.bf16.msra.mxu1 %v2691_v11 }
 0x327   :  { %2334 = vmatprep.subr.bf16.mxu1 %v2583_v0 }
 0x32a   :  { %2336 = vmatpush3.bf16.msra.mxu1 %v2704_v16 }
 0x32b   :  { %2337 = vmatprep.subr.bf16.mxu1 %v2583_v0 }
 0x32e   :  { %2339 = vmatpush3.bf16.msra.mxu1 %v2710_v19 }
 0x32f   :  { %2340 = vmatprep.subr.bf16.mxu1 %v2583_v0 }
 0x332   :  { %2342 = vmatpush3.bf16.msra.mxu1 %v2716_v22 }
 0x333   :  { %2343 = vmatprep.subr.bf16.mxu1 %v2583_v0 }
 0x336   :  { %2345 = vmatpush3.bf16.msra.mxu1 %v2722_v25 }
 0x337   :  { %2346 = vmatprep.subr.bf16.mxu1 %v2583_v0 }
 0x33a   :  { %2348 = vmatpush3.bf16.msra.mxu1 %v2728_v28 }
 0x33b   :  { %2349 = vmatprep.subr.bf16.mxu1 %v2583_v0 }
 0x3f0   :  { %v798_v3 = vpop.f32.mrb[2].mxu1 }
 0x3f1   :  { %2450 = vtanh.f32 %v798_v3  ;;  %v1990_v4 = vpop.f32.mrb[3].mxu1 }
 0x3fb   :  { %v2451_v5 = vpop.eup %2450 }
 0x3fc   :  { %v803_v7 = vmul.f32 0.8, %v2451_v5 }
 0x3fe   :  { %v805_v13 = vadd.f32 %v804_v9, %v803_v7 }
 0x400   :  { %807 = vst [vmem:[#allocation9 + $0x18] sm:$0xff] %v805_v13  ;;  %v819_v14 = vmul.f32 %v817_v10, %v805_v13  ;;  %2024 = vmatmul.mubr.f32.vlgmr.msra.gmra.mrb[4].mxu0 %v805_v13  ;;  %v989_v26 = vmul.f32 0.2, %v805_v13 }
 0x401   :  { %2321 = vmatpush3.bf16.msra.mxu0 %v2734_v31  ;;  %2034 = vmatprep.mubr.msk.f32.mxu0 %vm2584_vm0, %v2585_v1 }
 0x402   :  { %v820_v15 = vadd.f32 %v819_v14, %v635_v62  ;;  %2322 = vmatprep.subr.bf16.mxu0 %v2583_v0 }
 0x405   :  { %2324 = vmatpush3.bf16.msra.mxu0 %v2741_v34 }
 0x406   :  { %2355 = vmatprep.subr.bf16.mxu0 %v2583_v0 }
 0x408   :  { %2035 = vmatmul.mubr.msk.f32.vlgmr.msra.gmra.mrb[4].mxu0 %vm164_vm2, %v823_v17 }
 0x409   :  { %2357 = vmatpush3.bf16.msra.mxu0 %v2682_v6  ;;  %2115 = vmatprep.mubr.msk.f32.mxu0 %vm2584_vm0, %v2585_v1 }
 0x40a   :  { %2358 = vmatprep.subr.bf16.mxu0 %v2583_v0 }
 0x40d   :  { %2360 = vmatpush3.bf16.msra.mxu0 %v2685_v8 }
 0x40e   :  { %2361 = vmatprep.subr.bf16.mxu0 %v2583_v0 }
 0x411   :  { %2363 = vmatpush3.bf16.msra.mxu0 %v2691_v11 }
 0x412   :  { %2364 = vmatprep.subr.bf16.mxu0 %v2583_v0 }
 0x415   :  { %2366 = vmatpush3.bf16.msra.mxu0 %v2704_v16 }
 0x416   :  { %2367 = vmatprep.subr.bf16.mxu0 %v2583_v0 }
 0x419   :  { %2369 = vmatpush3.bf16.msra.mxu0 %v2710_v19 }
 0x41a   :  { %2370 = vmatprep.subr.bf16.mxu0 %v2583_v0 }
 0x41d   :  { %2372 = vmatpush3.bf16.msra.mxu0 %v2716_v22 }
 0x41e   :  { %2373 = vmatprep.subr.bf16.mxu0 %v2583_v0 }
 0x421   :  { %2375 = vmatpush3.bf16.msra.mxu0 %v2722_v25 }
 0x422   :  { %2376 = vmatprep.subr.bf16.mxu0 %v2583_v0 }
 0x425   :  { %2378 = vmatpush3.bf16.msra.mxu0 %v2728_v28 }
 0x426   :  { %2379 = vmatprep.subr.bf16.mxu0 %v2583_v0 }
 0x4db   :  { %v983_v20 = vpop.f32.mrb[4].mxu0 }
 0x4dc   :  { %2452 = vtanh.f32 %v983_v20  ;;  %v2036_v21 = vpop.f32.mrb[5].mxu0 }
 0x4e6   :  { %v2453_v23 = vpop.eup %2452 }
 0x4e7   :  { %v988_v24 = vmul.f32 0.8, %v2453_v23 }
 0x4e9   :  { %v990_v29 = vadd.f32 %v989_v26, %v988_v24 }
 0x4eb   :  { %992 = vst [vmem:[#allocation9 + $0x20] sm:$0xff] %v990_v29  ;;  %v1004_v30 = vmul.f32 %v1002_v27, %v990_v29  ;;  %2070 = vmatmul.mubr.f32.vlgmr.msra.gmra.mrb[4].mxu1 %v990_v29 }
 0x4ec   :  { %2351 = vmatpush3.bf16.msra.mxu1 %v2734_v31  ;;  %2080 = vmatprep.mubr.msk.f32.mxu1 %vm2584_vm0, %v2585_v1 }
 0x4ed   :  { %v1005_v32 = vadd.f32 %v1004_v30, %v820_v15  ;;  %2352 = vmatprep.subr.bf16.mxu1 %v2583_v0 }
 0x4f0   :  { %2354 = vmatpush3.bf16.msra.mxu1 %v2741_v34 }
 0x4f1   :  { %2385 = vmatprep.subr.bf16.mxu1 %v2583_v0 }
 0x4f3   :  { %2081 = vmatmul.mubr.msk.f32.vlgmr.msra.gmra.mrb[4].mxu1 %vm164_vm2, %v1008_v33 }
 0x4f4   :  { %2387 = vmatpush3.bf16.msra.mxu1 %v2682_v6  ;;  %2161 = vmatprep.mubr.msk.f32.mxu1 %vm2584_vm0, %v2585_v1  ;;  %v1627_v6 = vsel %vm1626_vm8, 1.0, %v2585_v1 }
 0x4f5   :  { %2388 = vmatprep.subr.bf16.mxu1 %v2583_v0  ;;  %1371 = vperm.xlu0 %2442, %v1627_v6  }
 0x4f8   :  { %2390 = vmatpush3.bf16.msra.mxu1 %v2685_v8 }
 0x4f9   :  { %2391 = vmatprep.subr.bf16.mxu1 %v2583_v0  ;;  %1570 = vperm.xlu0 %2442, %v1567_v38  }
 0x4fc   :  { %2393 = vmatpush3.bf16.msra.mxu1 %v2691_v11 }
 0x4fd   :  { %2394 = vmatprep.subr.bf16.mxu1 %v2583_v0 }
 0x500   :  { %2396 = vmatpush3.bf16.msra.mxu1 %v2704_v16 }
 0x501   :  { %2397 = vmatprep.subr.bf16.mxu1 %v2583_v0 }
 0x504   :  { %2399 = vmatpush3.bf16.msra.mxu1 %v2710_v19 }
 0x505   :  { %2400 = vmatprep.subr.bf16.mxu1 %v2583_v0 }
 0x508   :  { %2402 = vmatpush3.bf16.msra.mxu1 %v2716_v22  ;;  %v1174_v22 = vmul.f32 0.2, %v990_v29 }
 0x509   :  { %2403 = vmatprep.subr.bf16.mxu1 %v2583_v0 }
 0x50c   :  { %2405 = vmatpush3.bf16.msra.mxu1 %v2722_v25 }
 0x50d   :  { %2406 = vmatprep.subr.bf16.mxu1 %v2583_v0 }
 0x510   :  { %2408 = vmatpush3.bf16.msra.mxu1 %v2728_v28 }
 0x511   :  { %2409 = vmatprep.subr.bf16.mxu1 %v2583_v0 }
 0x574   :  { %v1372_v45 = vpop.permute.xlu0 %1371 }
 0x5c6   :  { %v1168_v8 = vpop.f32.mrb[4].mxu1 }
 0x5c7   :  { %2454 = vtanh.f32 %v1168_v8  ;;  %v2082_v11 = vpop.f32.mrb[5].mxu1 }
 0x5d1   :  { %v2455_v16 = vpop.eup %2454 }
 0x5d2   :  { %v1173_v19 = vmul.f32 0.8, %v2455_v16 }
 0x5d4   :  { %v1175_v36 = vadd.f32 %v1174_v22, %v1173_v19 }
 0x5d6   :  { %1177 = vst [vmem:[#allocation9 + $0x28] sm:$0xff] %v1175_v36  ;;  %v1189_v25 = vmul.f32 %v1187_v35, %v1175_v36  ;;  %2116 = vmatmul.mubr.f32.vlgmr.msra.gmra.mrb[6].mxu0 %v1175_v36  ;;  %v1359_v44 = vmul.f32 0.2, %v1175_v36 }
 0x5d7   :  { %2381 = vmatpush3.bf16.msra.mxu0 %v2734_v31  ;;  %2126 = vmatprep.mubr.msk.f32.mxu0 %vm2584_vm0, %v2585_v1 }
 0x5d8   :  { %v1190_v28 = vadd.f32 %v1189_v25, %v1005_v32  ;;  %2382 = vmatprep.subr.bf16.mxu0 %v2583_v0 }
 0x5db   :  { %2384 = vmatpush3.bf16.msra.mxu0 %v2741_v34 }
 0x5de   :  { %2127 = vmatmul.mubr.msk.f32.vlgmr.msra.gmra.mrb[6].mxu0 %vm164_vm2, %v1193_v37 }
 0x6b1   :  { %v1353_v40 = vpop.f32.mrb[6].mxu0 }
 0x6b2   :  { %2456 = vtanh.f32 %v1353_v40  ;;  %v2128_v41 = vpop.f32.mrb[7].mxu0 }
 0x6bc   :  { %v2457_v42 = vpop.eup %2456 }
 0x6bd   :  { %v1358_v43 = vmul.f32 0.8, %v2457_v42 }
 0x6bf   :  { %v1360_v46 = vadd.f32 %v1359_v44, %v1358_v43 }
 0x6c1   :  { %1362 = vst [vmem:[#allocation9 + $0x30] sm:$0xff] %v1360_v46  ;;  %v1374_v47 = vmul.f32 %v1372_v45, %v1360_v46  ;;  %2162 = vmatmul.mubr.f32.vlgmr.msra.gmra.mrb[6].mxu1 %v1360_v46  ;;  %v1544_v53 = vmul.f32 0.2, %v1360_v46 }
 0x6c2   :  { %2411 = vmatpush3.bf16.msra.mxu1 %v2734_v31  ;;  %2172 = vmatprep.mubr.msk.f32.mxu1 %vm2584_vm0, %v2585_v1 }
 0x6c3   :  { %v1375_v12 = vadd.f32 %v1374_v47, %v1190_v28  ;;  %2412 = vmatprep.subr.bf16.mxu1 %v2583_v0 }
 0x6c6   :  { %2414 = vmatpush3.bf16.msra.mxu1 %v2741_v34 }
 0x6c9   :  { %2173 = vmatmul.mubr.msk.f32.vlgmr.msra.gmra.mrb[6].mxu1 %vm164_vm2, %v1378_v48 }
 0x79c   :  { %v1538_v49 = vpop.f32.mrb[6].mxu1 }
 0x79d   :  { %2458 = vtanh.f32 %v1538_v49  ;;  %v2174_v50 = vpop.f32.mrb[7].mxu1 }
 0x7a7   :  { %v2459_v51 = vpop.eup %2458 }
 0x7a8   :  { %v1543_v52 = vmul.f32 0.8, %v2459_v51 }
 0x7aa   :  { %v1545_v31 = vadd.f32 %v1544_v53, %v1543_v52 }
 0x7ac   :  { %1547 = vst [vmem:[#allocation9 + $0x38] sm:$0xff] %v1545_v31  ;;  %v1559_v1 = vmul.f32 %v1557_v54, %v1545_v31 }
 0x7ad   :  { %2537 = shalt.err (!%p2534_p0)
}
 0x7ae   :  { %s2538_s19 = scalar_lea.hbm %s2953_s5, 1024 }
 0x7af   :  { %p2539_p1 = scmp.ne.s32.totalorder %s2953_s5, %s2538_s19  ;;  %p2542_p2 = scmp.lt.u32.totalorder %s2538_s19, %s2953_s5 }
 0x7b1   :  { %p2544_p3 = pnand %p2542_p2, %p2539_p1 }
 0x7b3   :  { %2547 = shalt.err (!%p2544_p3)
}
 0x7b4   :  { %1586 = dma.vmem_to_hbm [thread:$0]  %s1581_s13, 1024, %s2953_s5, [#allocation5], %s2580_s9, %s2580_s9, %s2581_s10   ;;  %v1560_v0 = vadd.f32 %v1559_v1, %v1375_v12  ;;  %v1571_v34 = vpop.permute.xlu0 %1570 }
 0x7b5   :  { %s2548_s26 = scalar_lea.vmem %s1594_s15, 128  ;;  %p2553_p5 = scmp.lt.s32.totalorder %s1594_s15, %s1594_s15 }
 0x7b6   :  { %v1573_v55 = vmul.f32 %v1571_v34, %v1560_v0  ;;  %p2549_p4 = scmp.ne.s32.totalorder %s1594_s15, %s2548_s26  ;;  %p2554_p6 = scmp.lt.s32.totalorder %s2548_s26, %s2548_s26 }
 0x7b8   :  { %1574 = vst [vmem:[#allocation10] sm:$0xff] %v1573_v55  ;;  %p2555_p7 = por %p2554_p6, %p2553_p5 }
 0x7ba   :  { %p2556_p8 = pnand %p2555_p7, %p2549_p4 }
 0x7bc   :  { %2559 = shalt.err (!%p2556_p8)
}
 0x7bd   :  { %s2560_s29 = scalar_lea.hbm %s2954_s6, 128 }
 0x7be   :  { %p2561_p9 = scmp.ne.s32.totalorder %s2954_s6, %s2560_s29  ;;  %p2564_p10 = scmp.lt.u32.totalorder %s2560_s29, %s2954_s6 }
 0x7c0   :  { %p2566_p11 = pnand %p2564_p10, %p2561_p9 }
 0x7c2   :  { %2569 = shalt.err (!%p2566_p11)
}
 0x7c3   :  { %1596 = dma.vmem_to_hbm [thread:$0]  %s1594_s15, 128, %s2954_s6, [#allocation11]  }
 0x7c4   :  { %2574 = dma.done.wait [#allocation5], 1024  }
 0x7c5   :  { %2575 = vsyncadd [#allocation5], 4294966272 }
 0x7c6   :  { %2576 = dma.done.wait [#allocation11], 128  }
 0x7c7   :  { %2577 = vsyncadd [#allocation11], 4294967168 }
 0x7c8   :  { %1603 = vsyncpa [#allocation4], 1 }
 0x7c9   :  { %1604 = vsyncpa [#allocation7], 1 }
 0x7ca   :  { %1605 = vsyncpa [#allocation5], 1 }
 0x7cb   :  { %1606 = vsyncpa [#allocation11], 1 }

</bundles_post_ra>
